<compile_context>
chip_gen: v6e
topology: v6e:2x2x1
jax: 0.10.0
libtpu: 0.0.40
codegen_flags: <defaults>
</compile_context>

<pallas_src>
import math
import jax
import jax.numpy as jnp
from jax.experimental import pallas as pl
from jax.experimental.pallas import tpu as pltpu

# ----------------------------- mini-BERT config ------------------------------
VOCAB = 100
HIDDEN = 32
N_HEADS = 2
HEAD_DIM = HIDDEN // N_HEADS
INTERMEDIATE = 64
N_LAYERS = 2
MAX_POS = 64
N_TYPES = 2
LN_EPS = 1e-12


# ------------------------------ kernel helpers --------------------------------
def _layernorm(x, g, b):
    mu = jnp.mean(x, axis=-1, keepdims=True)
    var = jnp.mean(jnp.square(x - mu), axis=-1, keepdims=True)
    return (x - mu) * jax.lax.rsqrt(var + LN_EPS) * g + b


def fused_bert_kernel(ids_ref, mask_ref, wtab_ref, pt_ref, eg_ref, eb_ref,
                      wq_ref, bq_ref, wk_ref, bk_ref, wv_ref, bv_ref,
                      wo_ref, bo_ref, g1_ref, b1_ref,
                      wi_ref, bi_ref, wo2_ref, bo2_ref, g2_ref, b2_ref,
                      o_ref):
    rows, H = o_ref.shape            # rows = seq_block * tokens
    sb, _, T = mask_ref.shape        # sequences in this block, key length
    Vp = wtab_ref.shape[0]           # padded vocab (multiple of 128 lanes)

    # ---- embeddings: word gather via one-hot matmul (exact, f32 table) ----
    ids = ids_ref[...]                                               # (rows, 1) int32
    onehot = (jax.lax.broadcasted_iota(jnp.int32, (rows, Vp), 1) == ids)
    word = jnp.dot(onehot.astype(jnp.float32), wtab_ref[...],
                   preferred_element_type=jnp.float32)               # (rows, H)
    emb = (word.reshape(sb, T, H) + pt_ref[...][None, :, :]).reshape(rows, H)
    x = _layernorm(emb, eg_ref[...], eb_ref[...])                    # (rows, H) f32

    # additive attention bias over key positions, built in-kernel from the mask
    bias = (1.0 - mask_ref[...]) * -10000.0                          # (sb, 1, T)

    scale = 1.0 / math.sqrt(HEAD_DIM)
    for l in range(N_LAYERS):                                        # static layer loop
        xb = x.astype(jnp.bfloat16)
        q = jnp.dot(xb, wq_ref[l], preferred_element_type=jnp.float32) + bq_ref[l]
        k = jnp.dot(xb, wk_ref[l], preferred_element_type=jnp.float32) + bk_ref[l]
        v = jnp.dot(xb, wv_ref[l], preferred_element_type=jnp.float32) + bv_ref[l]
        q3 = q.reshape(sb, T, H)
        k3 = k.reshape(sb, T, H)
        v3 = v.reshape(sb, T, H)

        attn = jnp.zeros((rows, H), jnp.float32)
        for h in range(N_HEADS):                                     # static head loop
            sl = slice(h * HEAD_DIM, (h + 1) * HEAD_DIM)
            qh = q3[:, :, sl].astype(jnp.bfloat16)
            kh = k3[:, :, sl].astype(jnp.bfloat16)
            vh = v3[:, :, sl].astype(jnp.bfloat16)
            # batched QK^T without explicit transpose
            s = jnp.einsum('btd,bsd->bts', qh, kh,
                           preferred_element_type=jnp.float32) * scale + bias
            s = s - jnp.max(s, axis=-1, keepdims=True)
            p = jnp.exp(s)
            p = p * pl.reciprocal(jnp.sum(p, axis=-1, keepdims=True), approx=True)
            ctx = jnp.einsum('bts,bsd->btd', p.astype(jnp.bfloat16), vh,
                             preferred_element_type=jnp.float32)     # (sb, T, HD)
            # fold this head's context through its rows of W_O (no lane concat)
            attn = attn + jnp.dot(
                ctx.reshape(rows, HEAD_DIM).astype(jnp.bfloat16),
                wo_ref[l, sl, :],
                preferred_element_type=jnp.float32)
        attn = attn + bo_ref[l]
        x1 = _layernorm(x + attn, g1_ref[l], b1_ref[l])

        h1 = jnp.dot(x1.astype(jnp.bfloat16), wi_ref[l],
                     preferred_element_type=jnp.float32) + bi_ref[l]
        # exact (erf) GELU, as in HF BERT -- kept in f32 (v5e has no bf16 VPU/EUP)
        h1 = 0.5 * h1 * (1.0 + jax.lax.erf(h1 * (1.0 / math.sqrt(2.0))))
        ffn = jnp.dot(h1.astype(jnp.bfloat16), wo2_ref[l],
                      preferred_element_type=jnp.float32) + bo2_ref[l]
        x = _layernorm(x1 + ffn, g2_ref[l], b2_ref[l])

    o_ref[...] = x.astype(o_ref.dtype)


# ------------------------------ pallas wrapper --------------------------------
def _full_spec(arr):
    nd = arr.ndim
    return pl.BlockSpec(arr.shape, lambda i, nd=nd: (0,) * nd)


def bert_token_embedder(input_ids, attention_mask, params, seq_block=None):
    """Equivalent of BertTokenEmbedder.forward (no cached bert_embeddings path)."""
    documents, sentences, tokens = input_ids.shape
    B = documents * sentences
    T = tokens

    # Sequence block per grid step: split the batch in two so v7x's two TensorCores each
    # take half ("parallel" axis); fall back to the whole batch if alignment disallows it.
    if seq_block is None:
        seq_block = B // 2 if (B % 2 == 0 and ((B // 2) * T) % 8 == 0) else B
    assert B % seq_block == 0 and (seq_block * T) % 8 == 0
    n_blocks = B // seq_block
    rows_blk = seq_block * T

    ids = input_ids.reshape(B * T, 1).astype(jnp.int32)
    mask = attention_mask.reshape(B, 1, T).astype(jnp.float32)

    # vocab table padded to a lane-aligned row count; whole table lives in VMEM (~16 KiB)
    Vp = ((VOCAB + 127) // 128) * 128
    wtab = jnp.zeros((Vp, HIDDEN), jnp.float32).at[:VOCAB].set(
        params["word_emb"].astype(jnp.float32))
    pt = (params["pos_emb"][:T] + params["type_emb"][0][None, :]).astype(jnp.float32)
    eg = params["emb_g"].reshape(1, HIDDEN).astype(jnp.float32)
    eb = params["emb_b"].reshape(1, HIDDEN).astype(jnp.float32)

    layers = params["layers"]

    def stack_w(key):   # matmul weights -> bf16 for the MXU
        return jnp.stack([lp[key] for lp in layers]).astype(jnp.bfloat16)

    def stack_v(key):   # biases / LN params -> (L, 1, dim) f32
        return jnp.stack([lp[key] for lp in layers]).astype(jnp.float32)[:, None, :]

    weights = [
        stack_w("wq"), stack_v("bq"), stack_w("wk"), stack_v("bk"),
        stack_w("wv"), stack_v("bv"), stack_w("wo"), stack_v("bo"),
        stack_v("g1"), stack_v("b1"), stack_w("wi"), stack_v("bi"),
        stack_w("wo2"), stack_v("bo2"), stack_v("g2"), stack_v("b2"),
    ]

    in_specs = [
        pl.BlockSpec((rows_blk, 1), lambda i: (i, 0)),         # token ids
        pl.BlockSpec((seq_block, 1, T), lambda i: (i, 0, 0)),  # attention mask
        _full_spec(wtab), _full_spec(pt), _full_spec(eg), _full_spec(eb),
    ] + [_full_spec(w) for w in weights]

    out = pl.pallas_call(
        fused_bert_kernel,
        out_shape=jax.ShapeDtypeStruct((B * T, HIDDEN), jnp.float32),
        grid=(n_blocks,),
        in_specs=in_specs,
        out_specs=pl.BlockSpec((rows_blk, HIDDEN), lambda i: (i, 0)),
        compiler_params=pltpu.CompilerParams(dimension_semantics=("parallel",)),
    )(ids, mask, wtab, pt, eg, eb, *weights)

    return out.reshape(B, T, HIDDEN)


# ------------------------------ parameter init ---------------------------------
def init_params(key):
    def nrm(key, shape, scale=0.02):
        return scale * jax.random.normal(key, shape, dtype=jnp.float32)

    keys = jax.random.split(key, 4 + N_LAYERS)
    params = {
        "word_emb": nrm(keys[0], (VOCAB, HIDDEN)),
        "pos_emb": nrm(keys[1], (MAX_POS, HIDDEN)),
        "type_emb": nrm(keys[2], (N_TYPES, HIDDEN)),
        "emb_g": jnp.ones((HIDDEN,), jnp.float32),
        "emb_b": jnp.zeros((HIDDEN,), jnp.float32),
        "layers": [],
    }
    for l in range(N_LAYERS):
        lk = jax.random.split(keys[4 + l], 6)
        # Linear weights stored already transposed to (in, out) so the kernel does x @ W + b.
        layer = {
            "wq": nrm(lk[0], (HIDDEN, HIDDEN)), "bq": jnp.zeros((HIDDEN,), jnp.float32),
            "wk": nrm(lk[1], (HIDDEN, HIDDEN)), "bk": jnp.zeros((HIDDEN,), jnp.float32),
            "wv": nrm(lk[2], (HIDDEN, HIDDEN)), "bv": jnp.zeros((HIDDEN,), jnp.float32),
            "wo": nrm(lk[3], (HIDDEN, HIDDEN)), "bo": jnp.zeros((HIDDEN,), jnp.float32),
            "g1": jnp.ones((HIDDEN,), jnp.float32), "b1": jnp.zeros((HIDDEN,), jnp.float32),
            "wi": nrm(lk[4], (HIDDEN, INTERMEDIATE)), "bi": jnp.zeros((INTERMEDIATE,), jnp.float32),
            "wo2": nrm(lk[5], (INTERMEDIATE, HIDDEN)), "bo2": jnp.zeros((HIDDEN,), jnp.float32),
            "g2": jnp.ones((HIDDEN,), jnp.float32), "b2": jnp.zeros((HIDDEN,), jnp.float32),
        }
        params["layers"].append(layer)
    return params


# ----------------------------------- main ---------------------------------------
if __name__ == "__main__":
    key = jax.random.PRNGKey(0)
    k_param, k_ids, k_len = jax.random.split(key, 3)

    documents, sentences, tokens = 2, 2, 8
    params = init_params(k_param)

    input_ids = jax.random.randint(k_ids, (documents, sentences, tokens), 0, VOCAB,
                                   dtype=jnp.int32)
    lengths = jax.random.randint(k_len, (documents, sentences, 1), 3, tokens + 1,
                                 dtype=jnp.int32)
    attention_mask = (jnp.arange(tokens)[None, None, :] < lengths).astype(jnp.int32)

    out = bert_token_embedder(input_ids, attention_mask, params)
    out = jax.block_until_ready(out)

    assert out.shape == (documents * sentences, tokens, HIDDEN), out.shape
    assert out.dtype == jnp.float32
    assert bool(jnp.all(jnp.isfinite(out)))
    print("KERNEL_OK")
</pallas_src>

<mosaic_0001>
module attributes {stable_mosaic.version = 11 : i64} {
  func.func @fused_bert_kernel(%arg0: i32, %arg1: memref<16x1xi32, #tpu.memory_space<vmem>>, %arg2: memref<2x1x8xf32, #tpu.memory_space<vmem>>, %arg3: memref<128x32xf32, #tpu.memory_space<vmem>>, %arg4: memref<8x32xf32, #tpu.memory_space<vmem>>, %arg5: memref<1x32xf32, #tpu.memory_space<vmem>>, %arg6: memref<1x32xf32, #tpu.memory_space<vmem>>, %arg7: memref<2x32x32xbf16, #tpu.memory_space<vmem>>, %arg8: memref<2x1x32xf32, #tpu.memory_space<vmem>>, %arg9: memref<2x32x32xbf16, #tpu.memory_space<vmem>>, %arg10: memref<2x1x32xf32, #tpu.memory_space<vmem>>, %arg11: memref<2x32x32xbf16, #tpu.memory_space<vmem>>, %arg12: memref<2x1x32xf32, #tpu.memory_space<vmem>>, %arg13: memref<2x32x32xbf16, #tpu.memory_space<vmem>>, %arg14: memref<2x1x32xf32, #tpu.memory_space<vmem>>, %arg15: memref<2x1x32xf32, #tpu.memory_space<vmem>>, %arg16: memref<2x1x32xf32, #tpu.memory_space<vmem>>, %arg17: memref<2x32x64xbf16, #tpu.memory_space<vmem>>, %arg18: memref<2x1x64xf32, #tpu.memory_space<vmem>>, %arg19: memref<2x64x32xbf16, #tpu.memory_space<vmem>>, %arg20: memref<2x1x32xf32, #tpu.memory_space<vmem>>, %arg21: memref<2x1x32xf32, #tpu.memory_space<vmem>>, %arg22: memref<2x1x32xf32, #tpu.memory_space<vmem>>, %arg23: memref<16x32xf32, #tpu.memory_space<vmem>>) attributes {dimension_semantics = [#tpu.dimension_semantics<parallel>], iteration_bounds = array<i64: 2>, scalar_prefetch = 0 : i64, scratch_operands = 0 : i64, tpu.core_type = #tpu.core_type<tc>, window_params = [{transform_indices = @transform_0, window_bounds = array<i64: 16, 1>}, {transform_indices = @transform_1, window_bounds = array<i64: 2, 1, 8>}, {pipeline_mode = #tpu.pipeline_mode<synchronous>, transform_indices = @transform_2, window_bounds = array<i64: 128, 32>}, {pipeline_mode = #tpu.pipeline_mode<synchronous>, transform_indices = @transform_3, window_bounds = array<i64: 8, 32>}, {pipeline_mode = #tpu.pipeline_mode<synchronous>, transform_indices = @transform_4, window_bounds = array<i64: 1, 32>}, {pipeline_mode = #tpu.pipeline_mode<synchronous>, transform_indices = @transform_5, window_bounds = array<i64: 1, 32>}, {pipeline_mode = #tpu.pipeline_mode<synchronous>, transform_indices = @transform_6, window_bounds = array<i64: 2, 32, 32>}, {pipeline_mode = #tpu.pipeline_mode<synchronous>, transform_indices = @transform_7, window_bounds = array<i64: 2, 1, 32>}, {pipeline_mode = #tpu.pipeline_mode<synchronous>, transform_indices = @transform_8, window_bounds = array<i64: 2, 32, 32>}, {pipeline_mode = #tpu.pipeline_mode<synchronous>, transform_indices = @transform_9, window_bounds = array<i64: 2, 1, 32>}, {pipeline_mode = #tpu.pipeline_mode<synchronous>, transform_indices = @transform_10, window_bounds = array<i64: 2, 32, 32>}, {pipeline_mode = #tpu.pipeline_mode<synchronous>, transform_indices = @transform_11, window_bounds = array<i64: 2, 1, 32>}, {pipeline_mode = #tpu.pipeline_mode<synchronous>, transform_indices = @transform_12, window_bounds = array<i64: 2, 32, 32>}, {pipeline_mode = #tpu.pipeline_mode<synchronous>, transform_indices = @transform_13, window_bounds = array<i64: 2, 1, 32>}, {pipeline_mode = #tpu.pipeline_mode<synchronous>, transform_indices = @transform_14, window_bounds = array<i64: 2, 1, 32>}, {pipeline_mode = #tpu.pipeline_mode<synchronous>, transform_indices = @transform_15, window_bounds = array<i64: 2, 1, 32>}, {pipeline_mode = #tpu.pipeline_mode<synchronous>, transform_indices = @transform_16, window_bounds = array<i64: 2, 32, 64>}, {pipeline_mode = #tpu.pipeline_mode<synchronous>, transform_indices = @transform_17, window_bounds = array<i64: 2, 1, 64>}, {pipeline_mode = #tpu.pipeline_mode<synchronous>, transform_indices = @transform_18, window_bounds = array<i64: 2, 64, 32>}, {pipeline_mode = #tpu.pipeline_mode<synchronous>, transform_indices = @transform_19, window_bounds = array<i64: 2, 1, 32>}, {pipeline_mode = #tpu.pipeline_mode<synchronous>, transform_indices = @transform_20, window_bounds = array<i64: 2, 1, 32>}, {pipeline_mode = #tpu.pipeline_mode<synchronous>, transform_indices = @transform_21, window_bounds = array<i64: 2, 1, 32>}, {transform_indices = @transform_22, window_bounds = array<i64: 16, 32>}]} {
    %c0 = arith.constant 0 : index
    %c0_0 = arith.constant 0 : index
    %0 = vector.load %arg1[%c0, %c0_0] : memref<16x1xi32, #tpu.memory_space<vmem>>, vector<16x1xi32>
    %1 = tpu.iota {dimensions = array<i32: 1>} : vector<16x128xi32>
    %2 = vector.broadcast %0 : vector<16x1xi32> to vector<16x128xi32>
    %3 = arith.cmpi eq, %1, %2 : vector<16x128xi32>
    %4 = arith.extui %3 : vector<16x128xi1> to vector<16x128xi32>
    %5 = arith.sitofp %4 : vector<16x128xi32> to vector<16x128xf32>
    %c0_1 = arith.constant 0 : index
    %c0_2 = arith.constant 0 : index
    %6 = vector.load %arg3[%c0_1, %c0_2] : memref<128x32xf32, #tpu.memory_space<vmem>>, vector<128x32xf32>
    %cst = arith.constant dense<0.000000e+00> : vector<16x32xf32>
    %7 = tpu.matmul %5, %6, %cst {dimension_numbers = #tpu.dot_dimension_numbers<[1], [0], [0], [1], [0, 0, 1, 1], [], []>} : vector<16x128xf32>, vector<128x32xf32>, vector<16x32xf32> -> vector<16x32xf32>
    %8 = vector.shape_cast %7 : vector<16x32xf32> to vector<2x8x32xf32>
    %c0_3 = arith.constant 0 : index
    %c0_4 = arith.constant 0 : index
    %9 = vector.load %arg4[%c0_3, %c0_4] : memref<8x32xf32, #tpu.memory_space<vmem>>, vector<8x32xf32>
    %10 = vector.shape_cast %9 : vector<8x32xf32> to vector<1x8x32xf32>
    %11 = vector.broadcast %10 : vector<1x8x32xf32> to vector<2x8x32xf32>
    %12 = arith.addf %8, %11 : vector<2x8x32xf32>
    %13 = vector.shape_cast %12 : vector<2x8x32xf32> to vector<16x32xf32>
    %c0_5 = arith.constant 0 : index
    %c0_6 = arith.constant 0 : index
    %14 = vector.load %arg5[%c0_5, %c0_6] : memref<1x32xf32, #tpu.memory_space<vmem>>, vector<1x32xf32>
    %c0_7 = arith.constant 0 : index
    %c0_8 = arith.constant 0 : index
    %15 = vector.load %arg6[%c0_7, %c0_8] : memref<1x32xf32, #tpu.memory_space<vmem>>, vector<1x32xf32>
    %cst_9 = arith.constant dense<0.000000e+00> : vector<16xf32>
    %16 = vector.multi_reduction <add>, %13, %cst_9 [1] : vector<16x32xf32> to vector<16xf32>
    %17 = vector.shape_cast %16 : vector<16xf32> to vector<16x1xf32>
    %cst_10 = arith.constant 3.200000e+01 : f32
    %18 = vector.broadcast %cst_10 : f32 to vector<16x1xf32>
    %19 = arith.divf %17, %18 : vector<16x1xf32>
    %20 = vector.broadcast %19 : vector<16x1xf32> to vector<16x32xf32>
    %21 = arith.subf %13, %20 : vector<16x32xf32>
    %22 = arith.mulf %21, %21 : vector<16x32xf32>
    %cst_11 = arith.constant dense<0.000000e+00> : vector<16xf32>
    %23 = vector.multi_reduction <add>, %22, %cst_11 [1] : vector<16x32xf32> to vector<16xf32>
    %24 = vector.shape_cast %23 : vector<16xf32> to vector<16x1xf32>
    %cst_12 = arith.constant 3.200000e+01 : f32
    %25 = vector.broadcast %cst_12 : f32 to vector<16x1xf32>
    %26 = arith.divf %24, %25 : vector<16x1xf32>
    %27 = vector.broadcast %19 : vector<16x1xf32> to vector<16x32xf32>
    %28 = arith.subf %13, %27 : vector<16x32xf32>
    %cst_13 = arith.constant 9.99999996E-13 : f32
    %29 = vector.broadcast %cst_13 : f32 to vector<16x1xf32>
    %30 = arith.addf %26, %29 : vector<16x1xf32>
    %31 = math.rsqrt %30 : vector<16x1xf32>
    %32 = vector.broadcast %31 : vector<16x1xf32> to vector<16x32xf32>
    %33 = arith.mulf %28, %32 : vector<16x32xf32>
    %34 = vector.broadcast %14 : vector<1x32xf32> to vector<16x32xf32>
    %35 = arith.mulf %33, %34 : vector<16x32xf32>
    %36 = vector.broadcast %15 : vector<1x32xf32> to vector<16x32xf32>
    %37 = arith.addf %35, %36 : vector<16x32xf32>
    %c0_14 = arith.constant 0 : index
    %c0_15 = arith.constant 0 : index
    %c0_16 = arith.constant 0 : index
    %38 = vector.load %arg2[%c0_14, %c0_15, %c0_16] : memref<2x1x8xf32, #tpu.memory_space<vmem>>, vector<2x1x8xf32>
    %cst_17 = arith.constant 1.000000e+00 : f32
    %39 = vector.broadcast %cst_17 : f32 to vector<2x1x8xf32>
    %40 = arith.subf %39, %38 : vector<2x1x8xf32>
    %cst_18 = arith.constant -1.000000e+04 : f32
    %41 = vector.broadcast %cst_18 : f32 to vector<2x1x8xf32>
    %42 = arith.mulf %40, %41 : vector<2x1x8xf32>
    %43 = arith.truncf %37 : vector<16x32xf32> to vector<16x32xbf16>
    %c0_19 = arith.constant 0 : index
    %c0_20 = arith.constant 0 : index
    %c0_21 = arith.constant 0 : index
    %44 = vector.load %arg7[%c0_19, %c0_20, %c0_21] : memref<2x32x32xbf16, #tpu.memory_space<vmem>>, vector<1x32x32xbf16>
    %45 = vector.shape_cast %44 : vector<1x32x32xbf16> to vector<32x32xbf16>
    %cst_22 = arith.constant dense<0.000000e+00> : vector<16x32xf32>
    %46 = tpu.matmul %43, %45, %cst_22 {dimension_numbers = #tpu.dot_dimension_numbers<[1], [0], [0], [1], [0, 0, 1, 1], [], []>} : vector<16x32xbf16>, vector<32x32xbf16>, vector<16x32xf32> -> vector<16x32xf32>
    %c0_23 = arith.constant 0 : index
    %c0_24 = arith.constant 0 : index
    %c0_25 = arith.constant 0 : index
    %47 = vector.load %arg8[%c0_23, %c0_24, %c0_25] : memref<2x1x32xf32, #tpu.memory_space<vmem>>, vector<1x1x32xf32>
    %48 = vector.shape_cast %47 : vector<1x1x32xf32> to vector<1x32xf32>
    %49 = vector.broadcast %48 : vector<1x32xf32> to vector<16x32xf32>
    %50 = arith.addf %46, %49 : vector<16x32xf32>
    %c0_26 = arith.constant 0 : index
    %c0_27 = arith.constant 0 : index
    %c0_28 = arith.constant 0 : index
    %51 = vector.load %arg9[%c0_26, %c0_27, %c0_28] : memref<2x32x32xbf16, #tpu.memory_space<vmem>>, vector<1x32x32xbf16>
    %52 = vector.shape_cast %51 : vector<1x32x32xbf16> to vector<32x32xbf16>
    %cst_29 = arith.constant dense<0.000000e+00> : vector<16x32xf32>
    %53 = tpu.matmul %43, %52, %cst_29 {dimension_numbers = #tpu.dot_dimension_numbers<[1], [0], [0], [1], [0, 0, 1, 1], [], []>} : vector<16x32xbf16>, vector<32x32xbf16>, vector<16x32xf32> -> vector<16x32xf32>
    %c0_30 = arith.constant 0 : index
    %c0_31 = arith.constant 0 : index
    %c0_32 = arith.constant 0 : index
    %54 = vector.load %arg10[%c0_30, %c0_31, %c0_32] : memref<2x1x32xf32, #tpu.memory_space<vmem>>, vector<1x1x32xf32>
    %55 = vector.shape_cast %54 : vector<1x1x32xf32> to vector<1x32xf32>
    %56 = vector.broadcast %55 : vector<1x32xf32> to vector<16x32xf32>
    %57 = arith.addf %53, %56 : vector<16x32xf32>
    %c0_33 = arith.constant 0 : index
    %c0_34 = arith.constant 0 : index
    %c0_35 = arith.constant 0 : index
    %58 = vector.load %arg11[%c0_33, %c0_34, %c0_35] : memref<2x32x32xbf16, #tpu.memory_space<vmem>>, vector<1x32x32xbf16>
    %59 = vector.shape_cast %58 : vector<1x32x32xbf16> to vector<32x32xbf16>
    %cst_36 = arith.constant dense<0.000000e+00> : vector<16x32xf32>
    %60 = tpu.matmul %43, %59, %cst_36 {dimension_numbers = #tpu.dot_dimension_numbers<[1], [0], [0], [1], [0, 0, 1, 1], [], []>} : vector<16x32xbf16>, vector<32x32xbf16>, vector<16x32xf32> -> vector<16x32xf32>
    %c0_37 = arith.constant 0 : index
    %c0_38 = arith.constant 0 : index
    %c0_39 = arith.constant 0 : index
    %61 = vector.load %arg12[%c0_37, %c0_38, %c0_39] : memref<2x1x32xf32, #tpu.memory_space<vmem>>, vector<1x1x32xf32>
    %62 = vector.shape_cast %61 : vector<1x1x32xf32> to vector<1x32xf32>
    %63 = vector.broadcast %62 : vector<1x32xf32> to vector<16x32xf32>
    %64 = arith.addf %60, %63 : vector<16x32xf32>
    %65 = vector.shape_cast %50 : vector<16x32xf32> to vector<2x8x32xf32>
    %66 = vector.shape_cast %57 : vector<16x32xf32> to vector<2x8x32xf32>
    %67 = vector.shape_cast %64 : vector<16x32xf32> to vector<2x8x32xf32>
    %cst_40 = arith.constant 0.000000e+00 : f32
    %68 = vector.broadcast %cst_40 : f32 to vector<16x32xf32>
    %69 = vector.extract_strided_slice %65 {offsets = [0, 0, 0], sizes = [2, 8, 16], strides = [1, 1, 1]} : vector<2x8x32xf32> to vector<2x8x16xf32>
    %70 = arith.truncf %69 : vector<2x8x16xf32> to vector<2x8x16xbf16>
    %71 = vector.extract_strided_slice %66 {offsets = [0, 0, 0], sizes = [2, 8, 16], strides = [1, 1, 1]} : vector<2x8x32xf32> to vector<2x8x16xf32>
    %72 = arith.truncf %71 : vector<2x8x16xf32> to vector<2x8x16xbf16>
    %73 = vector.extract_strided_slice %67 {offsets = [0, 0, 0], sizes = [2, 8, 16], strides = [1, 1, 1]} : vector<2x8x32xf32> to vector<2x8x16xf32>
    %74 = arith.truncf %73 : vector<2x8x16xf32> to vector<2x8x16xbf16>
    "tpu.trace_start"() <{level = 10 : i32, message = "btd,bsd->bts"}> : () -> ()
    %cst_41 = arith.constant dense<0.000000e+00> : vector<2x8x8xf32>
    %75 = tpu.matmul %70, %72, %cst_41 {dimension_numbers = #tpu.dot_dimension_numbers<[2], [2], [1], [1], [0, 0, 0, 1, 1, 1], [0], [0]>} : vector<2x8x16xbf16>, vector<2x8x16xbf16>, vector<2x8x8xf32> -> vector<2x8x8xf32>
    "tpu.trace_stop"() : () -> ()
    %cst_42 = arith.constant 2.500000e-01 : f32
    %76 = vector.broadcast %cst_42 : f32 to vector<2x8x8xf32>
    %77 = arith.mulf %75, %76 : vector<2x8x8xf32>
    %78 = vector.broadcast %42 : vector<2x1x8xf32> to vector<2x8x8xf32>
    %79 = arith.addf %77, %78 : vector<2x8x8xf32>
    %cst_43 = arith.constant dense<0xFF800000> : vector<2x8xf32>
    %80 = vector.multi_reduction <maximumf>, %79, %cst_43 [2] : vector<2x8x8xf32> to vector<2x8xf32>
    %81 = vector.shape_cast %80 : vector<2x8xf32> to vector<2x8x1xf32>
    %82 = vector.broadcast %81 : vector<2x8x1xf32> to vector<2x8x8xf32>
    %83 = arith.subf %79, %82 : vector<2x8x8xf32>
    %84 = math.exp %83 : vector<2x8x8xf32>
    %cst_44 = arith.constant dense<0.000000e+00> : vector<2x8xf32>
    %85 = vector.multi_reduction <add>, %84, %cst_44 [2] : vector<2x8x8xf32> to vector<2x8xf32>
    %86 = vector.shape_cast %85 : vector<2x8xf32> to vector<2x8x1xf32>
    %87 = tpu.reciprocal %86 {approx = true} : vector<2x8x1xf32> -> vector<2x8x1xf32>
    %88 = vector.broadcast %87 : vector<2x8x1xf32> to vector<2x8x8xf32>
    %89 = arith.mulf %84, %88 : vector<2x8x8xf32>
    %90 = arith.truncf %89 : vector<2x8x8xf32> to vector<2x8x8xbf16>
    "tpu.trace_start"() <{level = 10 : i32, message = "bts,bsd->btd"}> : () -> ()
    %cst_45 = arith.constant dense<0.000000e+00> : vector<2x8x16xf32>
    %91 = tpu.matmul %90, %74, %cst_45 {dimension_numbers = #tpu.dot_dimension_numbers<[2], [1], [1], [2], [0, 0, 0, 1, 1, 2], [0], [0]>} : vector<2x8x8xbf16>, vector<2x8x16xbf16>, vector<2x8x16xf32> -> vector<2x8x16xf32>
    "tpu.trace_stop"() : () -> ()
    %92 = vector.shape_cast %91 : vector<2x8x16xf32> to vector<16x16xf32>
    %93 = arith.truncf %92 : vector<16x16xf32> to vector<16x16xbf16>
    %c0_46 = arith.constant 0 : index
    %c0_47 = arith.constant 0 : index
    %c0_48 = arith.constant 0 : index
    %94 = vector.load %arg13[%c0_46, %c0_47, %c0_48] : memref<2x32x32xbf16, #tpu.memory_space<vmem>>, vector<1x16x32xbf16>
    %95 = vector.shape_cast %94 : vector<1x16x32xbf16> to vector<16x32xbf16>
    %cst_49 = arith.constant dense<0.000000e+00> : vector<16x32xf32>
    %96 = tpu.matmul %93, %95, %cst_49 {dimension_numbers = #tpu.dot_dimension_numbers<[1], [0], [0], [1], [0, 0, 1, 1], [], []>} : vector<16x16xbf16>, vector<16x32xbf16>, vector<16x32xf32> -> vector<16x32xf32>
    %97 = arith.addf %68, %96 : vector<16x32xf32>
    %98 = vector.extract_strided_slice %65 {offsets = [0, 0, 16], sizes = [2, 8, 16], strides = [1, 1, 1]} : vector<2x8x32xf32> to vector<2x8x16xf32>
    %99 = arith.truncf %98 : vector<2x8x16xf32> to vector<2x8x16xbf16>
    %100 = vector.extract_strided_slice %66 {offsets = [0, 0, 16], sizes = [2, 8, 16], strides = [1, 1, 1]} : vector<2x8x32xf32> to vector<2x8x16xf32>
    %101 = arith.truncf %100 : vector<2x8x16xf32> to vector<2x8x16xbf16>
    %102 = vector.extract_strided_slice %67 {offsets = [0, 0, 16], sizes = [2, 8, 16], strides = [1, 1, 1]} : vector<2x8x32xf32> to vector<2x8x16xf32>
    %103 = arith.truncf %102 : vector<2x8x16xf32> to vector<2x8x16xbf16>
    "tpu.trace_start"() <{level = 10 : i32, message = "btd,bsd->bts"}> : () -> ()
    %cst_50 = arith.constant dense<0.000000e+00> : vector<2x8x8xf32>
    %104 = tpu.matmul %99, %101, %cst_50 {dimension_numbers = #tpu.dot_dimension_numbers<[2], [2], [1], [1], [0, 0, 0, 1, 1, 1], [0], [0]>} : vector<2x8x16xbf16>, vector<2x8x16xbf16>, vector<2x8x8xf32> -> vector<2x8x8xf32>
    "tpu.trace_stop"() : () -> ()
    %cst_51 = arith.constant 2.500000e-01 : f32
    %105 = vector.broadcast %cst_51 : f32 to vector<2x8x8xf32>
    %106 = arith.mulf %104, %105 : vector<2x8x8xf32>
    %107 = vector.broadcast %42 : vector<2x1x8xf32> to vector<2x8x8xf32>
    %108 = arith.addf %106, %107 : vector<2x8x8xf32>
    %cst_52 = arith.constant dense<0xFF800000> : vector<2x8xf32>
    %109 = vector.multi_reduction <maximumf>, %108, %cst_52 [2] : vector<2x8x8xf32> to vector<2x8xf32>
    %110 = vector.shape_cast %109 : vector<2x8xf32> to vector<2x8x1xf32>
    %111 = vector.broadcast %110 : vector<2x8x1xf32> to vector<2x8x8xf32>
    %112 = arith.subf %108, %111 : vector<2x8x8xf32>
    %113 = math.exp %112 : vector<2x8x8xf32>
    %cst_53 = arith.constant dense<0.000000e+00> : vector<2x8xf32>
    %114 = vector.multi_reduction <add>, %113, %cst_53 [2] : vector<2x8x8xf32> to vector<2x8xf32>
    %115 = vector.shape_cast %114 : vector<2x8xf32> to vector<2x8x1xf32>
    %116 = tpu.reciprocal %115 {approx = true} : vector<2x8x1xf32> -> vector<2x8x1xf32>
    %117 = vector.broadcast %116 : vector<2x8x1xf32> to vector<2x8x8xf32>
    %118 = arith.mulf %113, %117 : vector<2x8x8xf32>
    %119 = arith.truncf %118 : vector<2x8x8xf32> to vector<2x8x8xbf16>
    "tpu.trace_start"() <{level = 10 : i32, message = "bts,bsd->btd"}> : () -> ()
    %cst_54 = arith.constant dense<0.000000e+00> : vector<2x8x16xf32>
    %120 = tpu.matmul %119, %103, %cst_54 {dimension_numbers = #tpu.dot_dimension_numbers<[2], [1], [1], [2], [0, 0, 0, 1, 1, 2], [0], [0]>} : vector<2x8x8xbf16>, vector<2x8x16xbf16>, vector<2x8x16xf32> -> vector<2x8x16xf32>
    "tpu.trace_stop"() : () -> ()
    %121 = vector.shape_cast %120 : vector<2x8x16xf32> to vector<16x16xf32>
    %122 = arith.truncf %121 : vector<16x16xf32> to vector<16x16xbf16>
    %c0_55 = arith.constant 0 : index
    %c16 = arith.constant 16 : index
    %c0_56 = arith.constant 0 : index
    %123 = vector.load %arg13[%c0_55, %c16, %c0_56] : memref<2x32x32xbf16, #tpu.memory_space<vmem>>, vector<1x16x32xbf16>
    %124 = vector.shape_cast %123 : vector<1x16x32xbf16> to vector<16x32xbf16>
    %cst_57 = arith.constant dense<0.000000e+00> : vector<16x32xf32>
    %125 = tpu.matmul %122, %124, %cst_57 {dimension_numbers = #tpu.dot_dimension_numbers<[1], [0], [0], [1], [0, 0, 1, 1], [], []>} : vector<16x16xbf16>, vector<16x32xbf16>, vector<16x32xf32> -> vector<16x32xf32>
    %126 = arith.addf %97, %125 : vector<16x32xf32>
    %c0_58 = arith.constant 0 : index
    %c0_59 = arith.constant 0 : index
    %c0_60 = arith.constant 0 : index
    %127 = vector.load %arg14[%c0_58, %c0_59, %c0_60] : memref<2x1x32xf32, #tpu.memory_space<vmem>>, vector<1x1x32xf32>
    %128 = vector.shape_cast %127 : vector<1x1x32xf32> to vector<1x32xf32>
    %129 = vector.broadcast %128 : vector<1x32xf32> to vector<16x32xf32>
    %130 = arith.addf %126, %129 : vector<16x32xf32>
    %131 = arith.addf %37, %130 : vector<16x32xf32>
    %c0_61 = arith.constant 0 : index
    %c0_62 = arith.constant 0 : index
    %c0_63 = arith.constant 0 : index
    %132 = vector.load %arg15[%c0_61, %c0_62, %c0_63] : memref<2x1x32xf32, #tpu.memory_space<vmem>>, vector<1x1x32xf32>
    %133 = vector.shape_cast %132 : vector<1x1x32xf32> to vector<1x32xf32>
    %c0_64 = arith.constant 0 : index
    %c0_65 = arith.constant 0 : index
    %c0_66 = arith.constant 0 : index
    %134 = vector.load %arg16[%c0_64, %c0_65, %c0_66] : memref<2x1x32xf32, #tpu.memory_space<vmem>>, vector<1x1x32xf32>
    %135 = vector.shape_cast %134 : vector<1x1x32xf32> to vector<1x32xf32>
    %cst_67 = arith.constant dense<0.000000e+00> : vector<16xf32>
    %136 = vector.multi_reduction <add>, %131, %cst_67 [1] : vector<16x32xf32> to vector<16xf32>
    %137 = vector.shape_cast %136 : vector<16xf32> to vector<16x1xf32>
    %cst_68 = arith.constant 3.200000e+01 : f32
    %138 = vector.broadcast %cst_68 : f32 to vector<16x1xf32>
    %139 = arith.divf %137, %138 : vector<16x1xf32>
    %140 = vector.broadcast %139 : vector<16x1xf32> to vector<16x32xf32>
    %141 = arith.subf %131, %140 : vector<16x32xf32>
    %142 = arith.mulf %141, %141 : vector<16x32xf32>
    %cst_69 = arith.constant dense<0.000000e+00> : vector<16xf32>
    %143 = vector.multi_reduction <add>, %142, %cst_69 [1] : vector<16x32xf32> to vector<16xf32>
    %144 = vector.shape_cast %143 : vector<16xf32> to vector<16x1xf32>
    %cst_70 = arith.constant 3.200000e+01 : f32
    %145 = vector.broadcast %cst_70 : f32 to vector<16x1xf32>
    %146 = arith.divf %144, %145 : vector<16x1xf32>
    %147 = vector.broadcast %139 : vector<16x1xf32> to vector<16x32xf32>
    %148 = arith.subf %131, %147 : vector<16x32xf32>
    %cst_71 = arith.constant 9.99999996E-13 : f32
    %149 = vector.broadcast %cst_71 : f32 to vector<16x1xf32>
    %150 = arith.addf %146, %149 : vector<16x1xf32>
    %151 = math.rsqrt %150 : vector<16x1xf32>
    %152 = vector.broadcast %151 : vector<16x1xf32> to vector<16x32xf32>
    %153 = arith.mulf %148, %152 : vector<16x32xf32>
    %154 = vector.broadcast %133 : vector<1x32xf32> to vector<16x32xf32>
    %155 = arith.mulf %153, %154 : vector<16x32xf32>
    %156 = vector.broadcast %135 : vector<1x32xf32> to vector<16x32xf32>
    %157 = arith.addf %155, %156 : vector<16x32xf32>
    %158 = arith.truncf %157 : vector<16x32xf32> to vector<16x32xbf16>
    %c0_72 = arith.constant 0 : index
    %c0_73 = arith.constant 0 : index
    %c0_74 = arith.constant 0 : index
    %159 = vector.load %arg17[%c0_72, %c0_73, %c0_74] : memref<2x32x64xbf16, #tpu.memory_space<vmem>>, vector<1x32x64xbf16>
    %160 = vector.shape_cast %159 : vector<1x32x64xbf16> to vector<32x64xbf16>
    %cst_75 = arith.constant dense<0.000000e+00> : vector<16x64xf32>
    %161 = tpu.matmul %158, %160, %cst_75 {dimension_numbers = #tpu.dot_dimension_numbers<[1], [0], [0], [1], [0, 0, 1, 1], [], []>} : vector<16x32xbf16>, vector<32x64xbf16>, vector<16x64xf32> -> vector<16x64xf32>
    %c0_76 = arith.constant 0 : index
    %c0_77 = arith.constant 0 : index
    %c0_78 = arith.constant 0 : index
    %162 = vector.load %arg18[%c0_76, %c0_77, %c0_78] : memref<2x1x64xf32, #tpu.memory_space<vmem>>, vector<1x1x64xf32>
    %163 = vector.shape_cast %162 : vector<1x1x64xf32> to vector<1x64xf32>
    %164 = vector.broadcast %163 : vector<1x64xf32> to vector<16x64xf32>
    %165 = arith.addf %161, %164 : vector<16x64xf32>
    %cst_79 = arith.constant 5.000000e-01 : f32
    %166 = vector.broadcast %cst_79 : f32 to vector<16x64xf32>
    %167 = arith.mulf %166, %165 : vector<16x64xf32>
    %cst_80 = arith.constant 0.707106769 : f32
    %168 = vector.broadcast %cst_80 : f32 to vector<16x64xf32>
    %169 = arith.mulf %165, %168 : vector<16x64xf32>
    %170 = math.erf %169 : vector<16x64xf32>
    %cst_81 = arith.constant 1.000000e+00 : f32
    %171 = vector.broadcast %cst_81 : f32 to vector<16x64xf32>
    %172 = arith.addf %171, %170 : vector<16x64xf32>
    %173 = arith.mulf %167, %172 : vector<16x64xf32>
    %174 = arith.truncf %173 : vector<16x64xf32> to vector<16x64xbf16>
    %c0_82 = arith.constant 0 : index
    %c0_83 = arith.constant 0 : index
    %c0_84 = arith.constant 0 : index
    %175 = vector.load %arg19[%c0_82, %c0_83, %c0_84] : memref<2x64x32xbf16, #tpu.memory_space<vmem>>, vector<1x64x32xbf16>
    %176 = vector.shape_cast %175 : vector<1x64x32xbf16> to vector<64x32xbf16>
    %cst_85 = arith.constant dense<0.000000e+00> : vector<16x32xf32>
    %177 = tpu.matmul %174, %176, %cst_85 {dimension_numbers = #tpu.dot_dimension_numbers<[1], [0], [0], [1], [0, 0, 1, 1], [], []>} : vector<16x64xbf16>, vector<64x32xbf16>, vector<16x32xf32> -> vector<16x32xf32>
    %c0_86 = arith.constant 0 : index
    %c0_87 = arith.constant 0 : index
    %c0_88 = arith.constant 0 : index
    %178 = vector.load %arg20[%c0_86, %c0_87, %c0_88] : memref<2x1x32xf32, #tpu.memory_space<vmem>>, vector<1x1x32xf32>
    %179 = vector.shape_cast %178 : vector<1x1x32xf32> to vector<1x32xf32>
    %180 = vector.broadcast %179 : vector<1x32xf32> to vector<16x32xf32>
    %181 = arith.addf %177, %180 : vector<16x32xf32>
    %182 = arith.addf %157, %181 : vector<16x32xf32>
    %c0_89 = arith.constant 0 : index
    %c0_90 = arith.constant 0 : index
    %c0_91 = arith.constant 0 : index
    %183 = vector.load %arg21[%c0_89, %c0_90, %c0_91] : memref<2x1x32xf32, #tpu.memory_space<vmem>>, vector<1x1x32xf32>
    %184 = vector.shape_cast %183 : vector<1x1x32xf32> to vector<1x32xf32>
    %c0_92 = arith.constant 0 : index
    %c0_93 = arith.constant 0 : index
    %c0_94 = arith.constant 0 : index
    %185 = vector.load %arg22[%c0_92, %c0_93, %c0_94] : memref<2x1x32xf32, #tpu.memory_space<vmem>>, vector<1x1x32xf32>
    %186 = vector.shape_cast %185 : vector<1x1x32xf32> to vector<1x32xf32>
    %cst_95 = arith.constant dense<0.000000e+00> : vector<16xf32>
    %187 = vector.multi_reduction <add>, %182, %cst_95 [1] : vector<16x32xf32> to vector<16xf32>
    %188 = vector.shape_cast %187 : vector<16xf32> to vector<16x1xf32>
    %cst_96 = arith.constant 3.200000e+01 : f32
    %189 = vector.broadcast %cst_96 : f32 to vector<16x1xf32>
    %190 = arith.divf %188, %189 : vector<16x1xf32>
    %191 = vector.broadcast %190 : vector<16x1xf32> to vector<16x32xf32>
    %192 = arith.subf %182, %191 : vector<16x32xf32>
    %193 = arith.mulf %192, %192 : vector<16x32xf32>
    %cst_97 = arith.constant dense<0.000000e+00> : vector<16xf32>
    %194 = vector.multi_reduction <add>, %193, %cst_97 [1] : vector<16x32xf32> to vector<16xf32>
    %195 = vector.shape_cast %194 : vector<16xf32> to vector<16x1xf32>
    %cst_98 = arith.constant 3.200000e+01 : f32
    %196 = vector.broadcast %cst_98 : f32 to vector<16x1xf32>
    %197 = arith.divf %195, %196 : vector<16x1xf32>
    %198 = vector.broadcast %190 : vector<16x1xf32> to vector<16x32xf32>
    %199 = arith.subf %182, %198 : vector<16x32xf32>
    %cst_99 = arith.constant 9.99999996E-13 : f32
    %200 = vector.broadcast %cst_99 : f32 to vector<16x1xf32>
    %201 = arith.addf %197, %200 : vector<16x1xf32>
    %202 = math.rsqrt %201 : vector<16x1xf32>
    %203 = vector.broadcast %202 : vector<16x1xf32> to vector<16x32xf32>
    %204 = arith.mulf %199, %203 : vector<16x32xf32>
    %205 = vector.broadcast %184 : vector<1x32xf32> to vector<16x32xf32>
    %206 = arith.mulf %204, %205 : vector<16x32xf32>
    %207 = vector.broadcast %186 : vector<1x32xf32> to vector<16x32xf32>
    %208 = arith.addf %206, %207 : vector<16x32xf32>
    %209 = arith.truncf %208 : vector<16x32xf32> to vector<16x32xbf16>
    %c1 = arith.constant 1 : index
    %c0_100 = arith.constant 0 : index
    %c0_101 = arith.constant 0 : index
    %210 = vector.load %arg7[%c1, %c0_100, %c0_101] : memref<2x32x32xbf16, #tpu.memory_space<vmem>>, vector<1x32x32xbf16>
    %211 = vector.shape_cast %210 : vector<1x32x32xbf16> to vector<32x32xbf16>
    %cst_102 = arith.constant dense<0.000000e+00> : vector<16x32xf32>
    %212 = tpu.matmul %209, %211, %cst_102 {dimension_numbers = #tpu.dot_dimension_numbers<[1], [0], [0], [1], [0, 0, 1, 1], [], []>} : vector<16x32xbf16>, vector<32x32xbf16>, vector<16x32xf32> -> vector<16x32xf32>
    %c1_103 = arith.constant 1 : index
    %c0_104 = arith.constant 0 : index
    %c0_105 = arith.constant 0 : index
    %213 = vector.load %arg8[%c1_103, %c0_104, %c0_105] : memref<2x1x32xf32, #tpu.memory_space<vmem>>, vector<1x1x32xf32>
    %214 = vector.shape_cast %213 : vector<1x1x32xf32> to vector<1x32xf32>
    %215 = vector.broadcast %214 : vector<1x32xf32> to vector<16x32xf32>
    %216 = arith.addf %212, %215 : vector<16x32xf32>
    %c1_106 = arith.constant 1 : index
    %c0_107 = arith.constant 0 : index
    %c0_108 = arith.constant 0 : index
    %217 = vector.load %arg9[%c1_106, %c0_107, %c0_108] : memref<2x32x32xbf16, #tpu.memory_space<vmem>>, vector<1x32x32xbf16>
    %218 = vector.shape_cast %217 : vector<1x32x32xbf16> to vector<32x32xbf16>
    %cst_109 = arith.constant dense<0.000000e+00> : vector<16x32xf32>
    %219 = tpu.matmul %209, %218, %cst_109 {dimension_numbers = #tpu.dot_dimension_numbers<[1], [0], [0], [1], [0, 0, 1, 1], [], []>} : vector<16x32xbf16>, vector<32x32xbf16>, vector<16x32xf32> -> vector<16x32xf32>
    %c1_110 = arith.constant 1 : index
    %c0_111 = arith.constant 0 : index
    %c0_112 = arith.constant 0 : index
    %220 = vector.load %arg10[%c1_110, %c0_111, %c0_112] : memref<2x1x32xf32, #tpu.memory_space<vmem>>, vector<1x1x32xf32>
    %221 = vector.shape_cast %220 : vector<1x1x32xf32> to vector<1x32xf32>
    %222 = vector.broadcast %221 : vector<1x32xf32> to vector<16x32xf32>
    %223 = arith.addf %219, %222 : vector<16x32xf32>
    %c1_113 = arith.constant 1 : index
    %c0_114 = arith.constant 0 : index
    %c0_115 = arith.constant 0 : index
    %224 = vector.load %arg11[%c1_113, %c0_114, %c0_115] : memref<2x32x32xbf16, #tpu.memory_space<vmem>>, vector<1x32x32xbf16>
    %225 = vector.shape_cast %224 : vector<1x32x32xbf16> to vector<32x32xbf16>
    %cst_116 = arith.constant dense<0.000000e+00> : vector<16x32xf32>
    %226 = tpu.matmul %209, %225, %cst_116 {dimension_numbers = #tpu.dot_dimension_numbers<[1], [0], [0], [1], [0, 0, 1, 1], [], []>} : vector<16x32xbf16>, vector<32x32xbf16>, vector<16x32xf32> -> vector<16x32xf32>
    %c1_117 = arith.constant 1 : index
    %c0_118 = arith.constant 0 : index
    %c0_119 = arith.constant 0 : index
    %227 = vector.load %arg12[%c1_117, %c0_118, %c0_119] : memref<2x1x32xf32, #tpu.memory_space<vmem>>, vector<1x1x32xf32>
    %228 = vector.shape_cast %227 : vector<1x1x32xf32> to vector<1x32xf32>
    %229 = vector.broadcast %228 : vector<1x32xf32> to vector<16x32xf32>
    %230 = arith.addf %226, %229 : vector<16x32xf32>
    %231 = vector.shape_cast %216 : vector<16x32xf32> to vector<2x8x32xf32>
    %232 = vector.shape_cast %223 : vector<16x32xf32> to vector<2x8x32xf32>
    %233 = vector.shape_cast %230 : vector<16x32xf32> to vector<2x8x32xf32>
    %cst_120 = arith.constant 0.000000e+00 : f32
    %234 = vector.broadcast %cst_120 : f32 to vector<16x32xf32>
    %235 = vector.extract_strided_slice %231 {offsets = [0, 0, 0], sizes = [2, 8, 16], strides = [1, 1, 1]} : vector<2x8x32xf32> to vector<2x8x16xf32>
    %236 = arith.truncf %235 : vector<2x8x16xf32> to vector<2x8x16xbf16>
    %237 = vector.extract_strided_slice %232 {offsets = [0, 0, 0], sizes = [2, 8, 16], strides = [1, 1, 1]} : vector<2x8x32xf32> to vector<2x8x16xf32>
    %238 = arith.truncf %237 : vector<2x8x16xf32> to vector<2x8x16xbf16>
    %239 = vector.extract_strided_slice %233 {offsets = [0, 0, 0], sizes = [2, 8, 16], strides = [1, 1, 1]} : vector<2x8x32xf32> to vector<2x8x16xf32>
    %240 = arith.truncf %239 : vector<2x8x16xf32> to vector<2x8x16xbf16>
    "tpu.trace_start"() <{level = 10 : i32, message = "btd,bsd->bts"}> : () -> ()
    %cst_121 = arith.constant dense<0.000000e+00> : vector<2x8x8xf32>
    %241 = tpu.matmul %236, %238, %cst_121 {dimension_numbers = #tpu.dot_dimension_numbers<[2], [2], [1], [1], [0, 0, 0, 1, 1, 1], [0], [0]>} : vector<2x8x16xbf16>, vector<2x8x16xbf16>, vector<2x8x8xf32> -> vector<2x8x8xf32>
    "tpu.trace_stop"() : () -> ()
    %cst_122 = arith.constant 2.500000e-01 : f32
    %242 = vector.broadcast %cst_122 : f32 to vector<2x8x8xf32>
    %243 = arith.mulf %241, %242 : vector<2x8x8xf32>
    %244 = vector.broadcast %42 : vector<2x1x8xf32> to vector<2x8x8xf32>
    %245 = arith.addf %243, %244 : vector<2x8x8xf32>
    %cst_123 = arith.constant dense<0xFF800000> : vector<2x8xf32>
    %246 = vector.multi_reduction <maximumf>, %245, %cst_123 [2] : vector<2x8x8xf32> to vector<2x8xf32>
    %247 = vector.shape_cast %246 : vector<2x8xf32> to vector<2x8x1xf32>
    %248 = vector.broadcast %247 : vector<2x8x1xf32> to vector<2x8x8xf32>
    %249 = arith.subf %245, %248 : vector<2x8x8xf32>
    %250 = math.exp %249 : vector<2x8x8xf32>
    %cst_124 = arith.constant dense<0.000000e+00> : vector<2x8xf32>
    %251 = vector.multi_reduction <add>, %250, %cst_124 [2] : vector<2x8x8xf32> to vector<2x8xf32>
    %252 = vector.shape_cast %251 : vector<2x8xf32> to vector<2x8x1xf32>
    %253 = tpu.reciprocal %252 {approx = true} : vector<2x8x1xf32> -> vector<2x8x1xf32>
    %254 = vector.broadcast %253 : vector<2x8x1xf32> to vector<2x8x8xf32>
    %255 = arith.mulf %250, %254 : vector<2x8x8xf32>
    %256 = arith.truncf %255 : vector<2x8x8xf32> to vector<2x8x8xbf16>
    "tpu.trace_start"() <{level = 10 : i32, message = "bts,bsd->btd"}> : () -> ()
    %cst_125 = arith.constant dense<0.000000e+00> : vector<2x8x16xf32>
    %257 = tpu.matmul %256, %240, %cst_125 {dimension_numbers = #tpu.dot_dimension_numbers<[2], [1], [1], [2], [0, 0, 0, 1, 1, 2], [0], [0]>} : vector<2x8x8xbf16>, vector<2x8x16xbf16>, vector<2x8x16xf32> -> vector<2x8x16xf32>
    "tpu.trace_stop"() : () -> ()
    %258 = vector.shape_cast %257 : vector<2x8x16xf32> to vector<16x16xf32>
    %259 = arith.truncf %258 : vector<16x16xf32> to vector<16x16xbf16>
    %c1_126 = arith.constant 1 : index
    %c0_127 = arith.constant 0 : index
    %c0_128 = arith.constant 0 : index
    %260 = vector.load %arg13[%c1_126, %c0_127, %c0_128] : memref<2x32x32xbf16, #tpu.memory_space<vmem>>, vector<1x16x32xbf16>
    %261 = vector.shape_cast %260 : vector<1x16x32xbf16> to vector<16x32xbf16>
    %cst_129 = arith.constant dense<0.000000e+00> : vector<16x32xf32>
    %262 = tpu.matmul %259, %261, %cst_129 {dimension_numbers = #tpu.dot_dimension_numbers<[1], [0], [0], [1], [0, 0, 1, 1], [], []>} : vector<16x16xbf16>, vector<16x32xbf16>, vector<16x32xf32> -> vector<16x32xf32>
    %263 = arith.addf %234, %262 : vector<16x32xf32>
    %264 = vector.extract_strided_slice %231 {offsets = [0, 0, 16], sizes = [2, 8, 16], strides = [1, 1, 1]} : vector<2x8x32xf32> to vector<2x8x16xf32>
    %265 = arith.truncf %264 : vector<2x8x16xf32> to vector<2x8x16xbf16>
    %266 = vector.extract_strided_slice %232 {offsets = [0, 0, 16], sizes = [2, 8, 16], strides = [1, 1, 1]} : vector<2x8x32xf32> to vector<2x8x16xf32>
    %267 = arith.truncf %266 : vector<2x8x16xf32> to vector<2x8x16xbf16>
    %268 = vector.extract_strided_slice %233 {offsets = [0, 0, 16], sizes = [2, 8, 16], strides = [1, 1, 1]} : vector<2x8x32xf32> to vector<2x8x16xf32>
    %269 = arith.truncf %268 : vector<2x8x16xf32> to vector<2x8x16xbf16>
    "tpu.trace_start"() <{level = 10 : i32, message = "btd,bsd->bts"}> : () -> ()
    %cst_130 = arith.constant dense<0.000000e+00> : vector<2x8x8xf32>
    %270 = tpu.matmul %265, %267, %cst_130 {dimension_numbers = #tpu.dot_dimension_numbers<[2], [2], [1], [1], [0, 0, 0, 1, 1, 1], [0], [0]>} : vector<2x8x16xbf16>, vector<2x8x16xbf16>, vector<2x8x8xf32> -> vector<2x8x8xf32>
    "tpu.trace_stop"() : () -> ()
    %cst_131 = arith.constant 2.500000e-01 : f32
    %271 = vector.broadcast %cst_131 : f32 to vector<2x8x8xf32>
    %272 = arith.mulf %270, %271 : vector<2x8x8xf32>
    %273 = vector.broadcast %42 : vector<2x1x8xf32> to vector<2x8x8xf32>
    %274 = arith.addf %272, %273 : vector<2x8x8xf32>
    %cst_132 = arith.constant dense<0xFF800000> : vector<2x8xf32>
    %275 = vector.multi_reduction <maximumf>, %274, %cst_132 [2] : vector<2x8x8xf32> to vector<2x8xf32>
    %276 = vector.shape_cast %275 : vector<2x8xf32> to vector<2x8x1xf32>
    %277 = vector.broadcast %276 : vector<2x8x1xf32> to vector<2x8x8xf32>
    %278 = arith.subf %274, %277 : vector<2x8x8xf32>
    %279 = math.exp %278 : vector<2x8x8xf32>
    %cst_133 = arith.constant dense<0.000000e+00> : vector<2x8xf32>
    %280 = vector.multi_reduction <add>, %279, %cst_133 [2] : vector<2x8x8xf32> to vector<2x8xf32>
    %281 = vector.shape_cast %280 : vector<2x8xf32> to vector<2x8x1xf32>
    %282 = tpu.reciprocal %281 {approx = true} : vector<2x8x1xf32> -> vector<2x8x1xf32>
    %283 = vector.broadcast %282 : vector<2x8x1xf32> to vector<2x8x8xf32>
    %284 = arith.mulf %279, %283 : vector<2x8x8xf32>
    %285 = arith.truncf %284 : vector<2x8x8xf32> to vector<2x8x8xbf16>
    "tpu.trace_start"() <{level = 10 : i32, message = "bts,bsd->btd"}> : () -> ()
    %cst_134 = arith.constant dense<0.000000e+00> : vector<2x8x16xf32>
    %286 = tpu.matmul %285, %269, %cst_134 {dimension_numbers = #tpu.dot_dimension_numbers<[2], [1], [1], [2], [0, 0, 0, 1, 1, 2], [0], [0]>} : vector<2x8x8xbf16>, vector<2x8x16xbf16>, vector<2x8x16xf32> -> vector<2x8x16xf32>
    "tpu.trace_stop"() : () -> ()
    %287 = vector.shape_cast %286 : vector<2x8x16xf32> to vector<16x16xf32>
    %288 = arith.truncf %287 : vector<16x16xf32> to vector<16x16xbf16>
    %c1_135 = arith.constant 1 : index
    %c16_136 = arith.constant 16 : index
    %c0_137 = arith.constant 0 : index
    %289 = vector.load %arg13[%c1_135, %c16_136, %c0_137] : memref<2x32x32xbf16, #tpu.memory_space<vmem>>, vector<1x16x32xbf16>
    %290 = vector.shape_cast %289 : vector<1x16x32xbf16> to vector<16x32xbf16>
    %cst_138 = arith.constant dense<0.000000e+00> : vector<16x32xf32>
    %291 = tpu.matmul %288, %290, %cst_138 {dimension_numbers = #tpu.dot_dimension_numbers<[1], [0], [0], [1], [0, 0, 1, 1], [], []>} : vector<16x16xbf16>, vector<16x32xbf16>, vector<16x32xf32> -> vector<16x32xf32>
    %292 = arith.addf %263, %291 : vector<16x32xf32>
    %c1_139 = arith.constant 1 : index
    %c0_140 = arith.constant 0 : index
    %c0_141 = arith.constant 0 : index
    %293 = vector.load %arg14[%c1_139, %c0_140, %c0_141] : memref<2x1x32xf32, #tpu.memory_space<vmem>>, vector<1x1x32xf32>
    %294 = vector.shape_cast %293 : vector<1x1x32xf32> to vector<1x32xf32>
    %295 = vector.broadcast %294 : vector<1x32xf32> to vector<16x32xf32>
    %296 = arith.addf %292, %295 : vector<16x32xf32>
    %297 = arith.addf %208, %296 : vector<16x32xf32>
    %c1_142 = arith.constant 1 : index
    %c0_143 = arith.constant 0 : index
    %c0_144 = arith.constant 0 : index
    %298 = vector.load %arg15[%c1_142, %c0_143, %c0_144] : memref<2x1x32xf32, #tpu.memory_space<vmem>>, vector<1x1x32xf32>
    %299 = vector.shape_cast %298 : vector<1x1x32xf32> to vector<1x32xf32>
    %c1_145 = arith.constant 1 : index
    %c0_146 = arith.constant 0 : index
    %c0_147 = arith.constant 0 : index
    %300 = vector.load %arg16[%c1_145, %c0_146, %c0_147] : memref<2x1x32xf32, #tpu.memory_space<vmem>>, vector<1x1x32xf32>
    %301 = vector.shape_cast %300 : vector<1x1x32xf32> to vector<1x32xf32>
    %cst_148 = arith.constant dense<0.000000e+00> : vector<16xf32>
    %302 = vector.multi_reduction <add>, %297, %cst_148 [1] : vector<16x32xf32> to vector<16xf32>
    %303 = vector.shape_cast %302 : vector<16xf32> to vector<16x1xf32>
    %cst_149 = arith.constant 3.200000e+01 : f32
    %304 = vector.broadcast %cst_149 : f32 to vector<16x1xf32>
    %305 = arith.divf %303, %304 : vector<16x1xf32>
    %306 = vector.broadcast %305 : vector<16x1xf32> to vector<16x32xf32>
    %307 = arith.subf %297, %306 : vector<16x32xf32>
    %308 = arith.mulf %307, %307 : vector<16x32xf32>
    %cst_150 = arith.constant dense<0.000000e+00> : vector<16xf32>
    %309 = vector.multi_reduction <add>, %308, %cst_150 [1] : vector<16x32xf32> to vector<16xf32>
    %310 = vector.shape_cast %309 : vector<16xf32> to vector<16x1xf32>
    %cst_151 = arith.constant 3.200000e+01 : f32
    %311 = vector.broadcast %cst_151 : f32 to vector<16x1xf32>
    %312 = arith.divf %310, %311 : vector<16x1xf32>
    %313 = vector.broadcast %305 : vector<16x1xf32> to vector<16x32xf32>
    %314 = arith.subf %297, %313 : vector<16x32xf32>
    %cst_152 = arith.constant 9.99999996E-13 : f32
    %315 = vector.broadcast %cst_152 : f32 to vector<16x1xf32>
    %316 = arith.addf %312, %315 : vector<16x1xf32>
    %317 = math.rsqrt %316 : vector<16x1xf32>
    %318 = vector.broadcast %317 : vector<16x1xf32> to vector<16x32xf32>
    %319 = arith.mulf %314, %318 : vector<16x32xf32>
    %320 = vector.broadcast %299 : vector<1x32xf32> to vector<16x32xf32>
    %321 = arith.mulf %319, %320 : vector<16x32xf32>
    %322 = vector.broadcast %301 : vector<1x32xf32> to vector<16x32xf32>
    %323 = arith.addf %321, %322 : vector<16x32xf32>
    %324 = arith.truncf %323 : vector<16x32xf32> to vector<16x32xbf16>
    %c1_153 = arith.constant 1 : index
    %c0_154 = arith.constant 0 : index
    %c0_155 = arith.constant 0 : index
    %325 = vector.load %arg17[%c1_153, %c0_154, %c0_155] : memref<2x32x64xbf16, #tpu.memory_space<vmem>>, vector<1x32x64xbf16>
    %326 = vector.shape_cast %325 : vector<1x32x64xbf16> to vector<32x64xbf16>
    %cst_156 = arith.constant dense<0.000000e+00> : vector<16x64xf32>
    %327 = tpu.matmul %324, %326, %cst_156 {dimension_numbers = #tpu.dot_dimension_numbers<[1], [0], [0], [1], [0, 0, 1, 1], [], []>} : vector<16x32xbf16>, vector<32x64xbf16>, vector<16x64xf32> -> vector<16x64xf32>
    %c1_157 = arith.constant 1 : index
    %c0_158 = arith.constant 0 : index
    %c0_159 = arith.constant 0 : index
    %328 = vector.load %arg18[%c1_157, %c0_158, %c0_159] : memref<2x1x64xf32, #tpu.memory_space<vmem>>, vector<1x1x64xf32>
    %329 = vector.shape_cast %328 : vector<1x1x64xf32> to vector<1x64xf32>
    %330 = vector.broadcast %329 : vector<1x64xf32> to vector<16x64xf32>
    %331 = arith.addf %327, %330 : vector<16x64xf32>
    %cst_160 = arith.constant 5.000000e-01 : f32
    %332 = vector.broadcast %cst_160 : f32 to vector<16x64xf32>
    %333 = arith.mulf %332, %331 : vector<16x64xf32>
    %cst_161 = arith.constant 0.707106769 : f32
    %334 = vector.broadcast %cst_161 : f32 to vector<16x64xf32>
    %335 = arith.mulf %331, %334 : vector<16x64xf32>
    %336 = math.erf %335 : vector<16x64xf32>
    %cst_162 = arith.constant 1.000000e+00 : f32
    %337 = vector.broadcast %cst_162 : f32 to vector<16x64xf32>
    %338 = arith.addf %337, %336 : vector<16x64xf32>
    %339 = arith.mulf %333, %338 : vector<16x64xf32>
    %340 = arith.truncf %339 : vector<16x64xf32> to vector<16x64xbf16>
    %c1_163 = arith.constant 1 : index
    %c0_164 = arith.constant 0 : index
    %c0_165 = arith.constant 0 : index
    %341 = vector.load %arg19[%c1_163, %c0_164, %c0_165] : memref<2x64x32xbf16, #tpu.memory_space<vmem>>, vector<1x64x32xbf16>
    %342 = vector.shape_cast %341 : vector<1x64x32xbf16> to vector<64x32xbf16>
    %cst_166 = arith.constant dense<0.000000e+00> : vector<16x32xf32>
    %343 = tpu.matmul %340, %342, %cst_166 {dimension_numbers = #tpu.dot_dimension_numbers<[1], [0], [0], [1], [0, 0, 1, 1], [], []>} : vector<16x64xbf16>, vector<64x32xbf16>, vector<16x32xf32> -> vector<16x32xf32>
    %c1_167 = arith.constant 1 : index
    %c0_168 = arith.constant 0 : index
    %c0_169 = arith.constant 0 : index
    %344 = vector.load %arg20[%c1_167, %c0_168, %c0_169] : memref<2x1x32xf32, #tpu.memory_space<vmem>>, vector<1x1x32xf32>
    %345 = vector.shape_cast %344 : vector<1x1x32xf32> to vector<1x32xf32>
    %346 = vector.broadcast %345 : vector<1x32xf32> to vector<16x32xf32>
    %347 = arith.addf %343, %346 : vector<16x32xf32>
    %348 = arith.addf %323, %347 : vector<16x32xf32>
    %c1_170 = arith.constant 1 : index
    %c0_171 = arith.constant 0 : index
    %c0_172 = arith.constant 0 : index
    %349 = vector.load %arg21[%c1_170, %c0_171, %c0_172] : memref<2x1x32xf32, #tpu.memory_space<vmem>>, vector<1x1x32xf32>
    %350 = vector.shape_cast %349 : vector<1x1x32xf32> to vector<1x32xf32>
    %c1_173 = arith.constant 1 : index
    %c0_174 = arith.constant 0 : index
    %c0_175 = arith.constant 0 : index
    %351 = vector.load %arg22[%c1_173, %c0_174, %c0_175] : memref<2x1x32xf32, #tpu.memory_space<vmem>>, vector<1x1x32xf32>
    %352 = vector.shape_cast %351 : vector<1x1x32xf32> to vector<1x32xf32>
    %cst_176 = arith.constant dense<0.000000e+00> : vector<16xf32>
    %353 = vector.multi_reduction <add>, %348, %cst_176 [1] : vector<16x32xf32> to vector<16xf32>
    %354 = vector.shape_cast %353 : vector<16xf32> to vector<16x1xf32>
    %cst_177 = arith.constant 3.200000e+01 : f32
    %355 = vector.broadcast %cst_177 : f32 to vector<16x1xf32>
    %356 = arith.divf %354, %355 : vector<16x1xf32>
    %357 = vector.broadcast %356 : vector<16x1xf32> to vector<16x32xf32>
    %358 = arith.subf %348, %357 : vector<16x32xf32>
    %359 = arith.mulf %358, %358 : vector<16x32xf32>
    %cst_178 = arith.constant dense<0.000000e+00> : vector<16xf32>
    %360 = vector.multi_reduction <add>, %359, %cst_178 [1] : vector<16x32xf32> to vector<16xf32>
    %361 = vector.shape_cast %360 : vector<16xf32> to vector<16x1xf32>
    %cst_179 = arith.constant 3.200000e+01 : f32
    %362 = vector.broadcast %cst_179 : f32 to vector<16x1xf32>
    %363 = arith.divf %361, %362 : vector<16x1xf32>
    %364 = vector.broadcast %356 : vector<16x1xf32> to vector<16x32xf32>
    %365 = arith.subf %348, %364 : vector<16x32xf32>
    %cst_180 = arith.constant 9.99999996E-13 : f32
    %366 = vector.broadcast %cst_180 : f32 to vector<16x1xf32>
    %367 = arith.addf %363, %366 : vector<16x1xf32>
    %368 = math.rsqrt %367 : vector<16x1xf32>
    %369 = vector.broadcast %368 : vector<16x1xf32> to vector<16x32xf32>
    %370 = arith.mulf %365, %369 : vector<16x32xf32>
    %371 = vector.broadcast %350 : vector<1x32xf32> to vector<16x32xf32>
    %372 = arith.mulf %370, %371 : vector<16x32xf32>
    %373 = vector.broadcast %352 : vector<1x32xf32> to vector<16x32xf32>
    %374 = arith.addf %372, %373 : vector<16x32xf32>
    %c0_181 = arith.constant 0 : index
    %c0_182 = arith.constant 0 : index
    %375 = vector.load %arg23[%c0_181, %c0_182] : memref<16x32xf32, #tpu.memory_space<vmem>>, vector<16x32xf32>
    tpu.vector_store %arg23[%c0_181, %c0_182], %374 {strides = array<i32>} : memref<16x32xf32, #tpu.memory_space<vmem>>, vector<16x32xf32>,
    return
  }
  func.func @transform_0(%arg0: i32) -> (i32, i32) {
    %c0_i32 = arith.constant 0 : i32
    %c0_i32_0 = arith.constant 0 : i32
    return %arg0, %c0_i32 : i32, i32
  }
  func.func @transform_1(%arg0: i32) -> (i32, i32, i32) {
    %c0_i32 = arith.constant 0 : i32
    %c0_i32_0 = arith.constant 0 : i32
    %c0_i32_1 = arith.constant 0 : i32
    return %arg0, %c0_i32, %c0_i32_0 : i32, i32, i32
  }
  func.func @transform_2(%arg0: i32) -> (i32, i32) {
    %c0_i32 = arith.constant 0 : i32
    %c0_i32_0 = arith.constant 0 : i32
    %c0_i32_1 = arith.constant 0 : i32
    return %c0_i32, %c0_i32_0 : i32, i32
  }
  func.func @transform_3(%arg0: i32) -> (i32, i32) {
    %c0_i32 = arith.constant 0 : i32
    %c0_i32_0 = arith.constant 0 : i32
    %c0_i32_1 = arith.constant 0 : i32
    return %c0_i32, %c0_i32_0 : i32, i32
  }
  func.func @transform_4(%arg0: i32) -> (i32, i32) {
    %c0_i32 = arith.constant 0 : i32
    %c0_i32_0 = arith.constant 0 : i32
    %c0_i32_1 = arith.constant 0 : i32
    return %c0_i32, %c0_i32_0 : i32, i32
  }
  func.func @transform_5(%arg0: i32) -> (i32, i32) {
    %c0_i32 = arith.constant 0 : i32
    %c0_i32_0 = arith.constant 0 : i32
    %c0_i32_1 = arith.constant 0 : i32
    return %c0_i32, %c0_i32_0 : i32, i32
  }
  func.func @transform_6(%arg0: i32) -> (i32, i32, i32) {
    %c0_i32 = arith.constant 0 : i32
    %c0_i32_0 = arith.constant 0 : i32
    %c0_i32_1 = arith.constant 0 : i32
    %c0_i32_2 = arith.constant 0 : i32
    return %c0_i32, %c0_i32_0, %c0_i32_1 : i32, i32, i32
  }
  func.func @transform_7(%arg0: i32) -> (i32, i32, i32) {
    %c0_i32 = arith.constant 0 : i32
    %c0_i32_0 = arith.constant 0 : i32
    %c0_i32_1 = arith.constant 0 : i32
    %c0_i32_2 = arith.constant 0 : i32
    return %c0_i32, %c0_i32_0, %c0_i32_1 : i32, i32, i32
  }
  func.func @transform_8(%arg0: i32) -> (i32, i32, i32) {
    %c0_i32 = arith.constant 0 : i32
    %c0_i32_0 = arith.constant 0 : i32
    %c0_i32_1 = arith.constant 0 : i32
    %c0_i32_2 = arith.constant 0 : i32
    return %c0_i32, %c0_i32_0, %c0_i32_1 : i32, i32, i32
  }
  func.func @transform_9(%arg0: i32) -> (i32, i32, i32) {
    %c0_i32 = arith.constant 0 : i32
    %c0_i32_0 = arith.constant 0 : i32
    %c0_i32_1 = arith.constant 0 : i32
    %c0_i32_2 = arith.constant 0 : i32
    return %c0_i32, %c0_i32_0, %c0_i32_1 : i32, i32, i32
  }
  func.func @transform_10(%arg0: i32) -> (i32, i32, i32) {
    %c0_i32 = arith.constant 0 : i32
    %c0_i32_0 = arith.constant 0 : i32
    %c0_i32_1 = arith.constant 0 : i32
    %c0_i32_2 = arith.constant 0 : i32
    return %c0_i32, %c0_i32_0, %c0_i32_1 : i32, i32, i32
  }
  func.func @transform_11(%arg0: i32) -> (i32, i32, i32) {
    %c0_i32 = arith.constant 0 : i32
    %c0_i32_0 = arith.constant 0 : i32
    %c0_i32_1 = arith.constant 0 : i32
    %c0_i32_2 = arith.constant 0 : i32
    return %c0_i32, %c0_i32_0, %c0_i32_1 : i32, i32, i32
  }
  func.func @transform_12(%arg0: i32) -> (i32, i32, i32) {
    %c0_i32 = arith.constant 0 : i32
    %c0_i32_0 = arith.constant 0 : i32
    %c0_i32_1 = arith.constant 0 : i32
    %c0_i32_2 = arith.constant 0 : i32
    return %c0_i32, %c0_i32_0, %c0_i32_1 : i32, i32, i32
  }
  func.func @transform_13(%arg0: i32) -> (i32, i32, i32) {
    %c0_i32 = arith.constant 0 : i32
    %c0_i32_0 = arith.constant 0 : i32
    %c0_i32_1 = arith.constant 0 : i32
    %c0_i32_2 = arith.constant 0 : i32
    return %c0_i32, %c0_i32_0, %c0_i32_1 : i32, i32, i32
  }
  func.func @transform_14(%arg0: i32) -> (i32, i32, i32) {
    %c0_i32 = arith.constant 0 : i32
    %c0_i32_0 = arith.constant 0 : i32
    %c0_i32_1 = arith.constant 0 : i32
    %c0_i32_2 = arith.constant 0 : i32
    return %c0_i32, %c0_i32_0, %c0_i32_1 : i32, i32, i32
  }
  func.func @transform_15(%arg0: i32) -> (i32, i32, i32) {
    %c0_i32 = arith.constant 0 : i32
    %c0_i32_0 = arith.constant 0 : i32
    %c0_i32_1 = arith.constant 0 : i32
    %c0_i32_2 = arith.constant 0 : i32
    return %c0_i32, %c0_i32_0, %c0_i32_1 : i32, i32, i32
  }
  func.func @transform_16(%arg0: i32) -> (i32, i32, i32) {
    %c0_i32 = arith.constant 0 : i32
    %c0_i32_0 = arith.constant 0 : i32
    %c0_i32_1 = arith.constant 0 : i32
    %c0_i32_2 = arith.constant 0 : i32
    return %c0_i32, %c0_i32_0, %c0_i32_1 : i32, i32, i32
  }
  func.func @transform_17(%arg0: i32) -> (i32, i32, i32) {
    %c0_i32 = arith.constant 0 : i32
    %c0_i32_0 = arith.constant 0 : i32
    %c0_i32_1 = arith.constant 0 : i32
    %c0_i32_2 = arith.constant 0 : i32
    return %c0_i32, %c0_i32_0, %c0_i32_1 : i32, i32, i32
  }
  func.func @transform_18(%arg0: i32) -> (i32, i32, i32) {
    %c0_i32 = arith.constant 0 : i32
    %c0_i32_0 = arith.constant 0 : i32
    %c0_i32_1 = arith.constant 0 : i32
    %c0_i32_2 = arith.constant 0 : i32
    return %c0_i32, %c0_i32_0, %c0_i32_1 : i32, i32, i32
  }
  func.func @transform_19(%arg0: i32) -> (i32, i32, i32) {
    %c0_i32 = arith.constant 0 : i32
    %c0_i32_0 = arith.constant 0 : i32
    %c0_i32_1 = arith.constant 0 : i32
    %c0_i32_2 = arith.constant 0 : i32
    return %c0_i32, %c0_i32_0, %c0_i32_1 : i32, i32, i32
  }
  func.func @transform_20(%arg0: i32) -> (i32, i32, i32) {
    %c0_i32 = arith.constant 0 : i32
    %c0_i32_0 = arith.constant 0 : i32
    %c0_i32_1 = arith.constant 0 : i32
    %c0_i32_2 = arith.constant 0 : i32
    return %c0_i32, %c0_i32_0, %c0_i32_1 : i32, i32, i32
  }
  func.func @transform_21(%arg0: i32) -> (i32, i32, i32) {
    %c0_i32 = arith.constant 0 : i32
    %c0_i32_0 = arith.constant 0 : i32
    %c0_i32_1 = arith.constant 0 : i32
    %c0_i32_2 = arith.constant 0 : i32
    return %c0_i32, %c0_i32_0, %c0_i32_1 : i32, i32, i32
  }
  func.func @transform_22(%arg0: i32) -> (i32, i32) {
    %c0_i32 = arith.constant 0 : i32
    %c0_i32_0 = arith.constant 0 : i32
    return %arg0, %c0_i32 : i32, i32
  }
}

</mosaic_0001>

<bundles_post_ra>
// kernel: tpu_custom_call.1
= control target key start
LH: loop header
LB: loop body
LE: loop exit
PB: predicated region body
PF: predicated region fallthrough
CT: control target
= control target key end

     0   :  { %s4364_s0 = inlined_call_operand.vmem [shape: s32[32,1], index: 0, kind: input, shape index: {}]   ;;  %s4365_s1 = inlined_call_operand.vmem [shape: f32[4,1,8], index: 1, kind: input, shape index: {}]   ;;  %s4366_s2 = inlined_call_operand.vmem [shape: f32[128,32], index: 2, kind: input, shape index: {}]   ;;  %s4367_s3 = inlined_call_operand.vmem [shape: f32[8,32], index: 3, kind: input, shape index: {}]   ;;  %s4368_s4 = inlined_call_operand.vmem [shape: f32[1,32], index: 4, kind: input, shape index: {}]   ;;  %s4369_s5 = inlined_call_operand.vmem [shape: f32[1,32], index: 5, kind: input, shape index: {}]   ;;  %s4370_s6 = inlined_call_operand.vmem [shape: bf16[2,32,32], index: 6, kind: input, shape index: {}]   ;;  %s4371_s7 = inlined_call_operand.vmem [shape: f32[2,1,32], index: 7, kind: input, shape index: {}]   ;;  %s4372_s8 = inlined_call_operand.vmem [shape: bf16[2,32,32], index: 8, kind: input, shape index: {}]   ;;  %s4373_s9 = inlined_call_operand.vmem [shape: f32[2,1,32], index: 9, kind: input, shape index: {}]   ;;  %s4374_s10 = inlined_call_operand.vmem [shape: bf16[2,32,32], index: 10, kind: input, shape index: {}]   ;;  %s4375_s11 = inlined_call_operand.vmem [shape: f32[2,1,32], index: 11, kind: input, shape index: {}]   ;;  %s4376_s12 = inlined_call_operand.vmem [shape: bf16[2,32,32], index: 12, kind: input, shape index: {}]   ;;  %s4377_s13 = inlined_call_operand.vmem [shape: f32[2,1,32], index: 13, kind: input, shape index: {}]   ;;  %s4378_s14 = inlined_call_operand.vmem [shape: f32[2,1,32], index: 14, kind: input, shape index: {}]   ;;  %s4379_s15 = inlined_call_operand.vmem [shape: f32[2,1,32], index: 15, kind: input, shape index: {}]   ;;  %s4380_s16 = inlined_call_operand.vmem [shape: bf16[2,32,64], index: 16, kind: input, shape index: {}]   ;;  %s4381_s17 = inlined_call_operand.vmem [shape: f32[2,1,64], index: 17, kind: input, shape index: {}]   ;;  %s4382_s18 = inlined_call_operand.vmem [shape: bf16[2,64,32], index: 18, kind: input, shape index: {}]   ;;  %s4383_s19 = inlined_call_operand.vmem [shape: f32[2,1,32], index: 19, kind: input, shape index: {}]   ;;  %s4384_s20 = inlined_call_operand.vmem [shape: f32[2,1,32], index: 20, kind: input, shape index: {}]   ;;  %s4385_s21 = inlined_call_operand.vmem [shape: f32[2,1,32], index: 21, kind: input, shape index: {}]   ;;  %s4386_s22 = inlined_call_operand.hbm [shape: f32[32,32], index: 22, kind: output, shape index: {}]  }
   0x1   :  { %4400 = sst [smem:[#allocation13_spill]] %s4364_s0 }
   0x2   :  { %4401 = sst [smem:[#allocation14_spill]] %s4365_s1 }
   0x3   :  { %4402 = sst [smem:[#allocation15_spill]] %s4366_s2 }
   0x4   :  { %4403 = sst [smem:[#allocation16_spill]] %s4367_s3 }
   0x5   :  { %4404 = sst [smem:[#allocation17_spill]] %s4368_s4 }
   0x6   :  { %4405 = sst [smem:[#allocation18_spill]] %s4369_s5 }
   0x7   :  { %4406 = sst [smem:[#allocation19_spill]] %s4370_s6 }
   0x8   :  { %4407 = sst [smem:[#allocation20_spill]] %s4371_s7 }
   0x9   :  { %4408 = sst [smem:[#allocation21_spill]] %s4386_s22 }
   0xa   :  { %27 = vsyncpa [#allocation3], 0 }
   0xb   :  { %29 = vsyncpa [#allocation3 + $0x1], 0  ;;  %s3803_s3 = smov 0   ;;  %s3805_s28 = smov 0  }
   0xc   :  { %s3807_s29 = smov 0   ;;  %s3809_s30 = smov 0  }
   0xd LB: > { %4409 = sst [smem:[#allocation5_spill]] %s3666_s3  ;;  %s3824_s4 = sadd.s32 4294967295, %s3678_s30   ;;  %s3678_s30 = sphi %s3809_s30, %s4433_s30   ;;  %s3674_s29 = sphi %s3807_s29, %s4435_s29   ;;  %s3670_s28 = sphi %s3805_s28, %s4437_s28   ;;  %s3666_s3 = sphi %s3803_s3, %s4436_s3  }
   0xe   : > { %4410 = sst [smem:[#allocation6_spill]] %s3674_s29  ;;  %s3012_s0 = sadd.s32 4294967294, %s3678_s30  }
   0xf   : > { %4411 = sst [smem:[#allocation7_spill]] %s3678_s30  ;;  %s3828_s23 = sadd.s32 1, %s3678_s30  }
  0x10   : > { %4412 = sst [smem:[#allocation8_spill]] %s3824_s4  ;;  %s514_s1 = sadd.s32 1, %s3674_s29 }
  0x11   : > { %4413 = sst [smem:[#allocation9_spill]] %s3828_s23  ;;  %s511_s5 = ssub.s32 %s3678_s30, %s3828_s23 }
  0x12   : > { %p524_p0 = scmp.ne.s32.totalorder %s3674_s29, %s3670_s28  ;;  %p512_p1 = scmp.eq.s32.totalorder %s511_s5, 0 }
  0x13   : > { %p525_p2 = scmp.eq.s32.totalorder %s3824_s4, 1  ;;  %p530_p3 = scmp.ne.s32.totalorder %s3670_s28, %s3666_s3 }
  0x14   : > { %p531_p4 = scmp.eq.s32.totalorder %s3012_s0, 1  ;;  %p3015_p7 = scmp.ge.s32.totalorder %s3678_s30, 1 }
  0x15   : > { %s3839_s24 = scalar_select %p512_p1, %s3674_s29, %s514_s1  }
  0x16   : > { %p3841_p5 = por %p525_p2, %p524_p0  ;;  %p3845_p6 = por %p531_p4, %p530_p3 }
  0x17   : > { %4414 = sst [smem:[#allocation10_spill]] %s3839_s24  ;;  %p626_p8 = scmp.lt.s32.totalorder %s3678_s30, 3 }
  0x18   : > { %s4415_s6 = scalar_select %p3841_p5, 1, 0 }
  0x19   : > { %s4417_s25 = scalar_select %p3845_p6, 1, 0 }
  0x1a   : > { %4416 = sst [smem:[#allocation11_spill]] %s4415_s6  ;;  %p627_p9 = pnand %p3015_p7, %p626_p8 }
  0x1b   : > { %4418 = sst [smem:[#allocation12_spill]] %s4417_s25  ;;  %s3017_s26 = sshll.u32 (!%p627_p9), %s3824_s4, 1 }
  0x1c   : > { %630 = sbr.rel (%p627_p9) target bundleno = 6068 (0x17b4), region = 108  ;;  %s4419_s5 = sld [smem:[#allocation15_spill]] (!%p627_p9) }
  0x1d   : > { %p693_p10 = scmp.lt.s32.totalorder (!%p627_p9), %s3017_s26, 3  ;;  %s4420_s25 = sld [smem:[#allocation14_spill]] (!%p627_p9) }
  0x1e   : > { %s4421_s6 = sld [smem:[#allocation13_spill]] (!%p627_p9)  ;;  %s689_s1 = sand.u32 (!%p627_p9), 1, %s3670_s28  }
  0x1f   : > { %s4422_s0 = sld [smem:[#allocation16_spill]] (!%p627_p9)  ;;  %s3016_s23 = sshll.u32 (!%p627_p9), %s689_s1, 4 }
  0x20   : > { %s4423_s24 = sld [smem:[#allocation19_spill]] (!%p627_p9) }
  0x21   : > { %v3680_v2 = vmov 0   ;;  %s4439_s26 = smov (!%p693_p10, %s3017_s26), 3  ;;  %v707_v4 = vlaneseq  ;;  %v3681_v32 = vmov 1.0   ;;  %vm817_vm2 = vcmask 261120   ;;  %s4426_s7 = sld [smem:[#allocation20_spill]] }
  0x22   : > { %v736_v0 = vld [vmem:[%s4419_s5 + $0x78] sm:$0xff]  ;;  %v735_v1 = vld [vmem:[%s4419_s5 + $0x70] sm:$0xff]  ;;  %3529 = vset.pattern.permute.xlu0 %v3680_v2  ;;  %v734_v3 = vld [vmem:[%s4419_s5 + $0x68] sm:$0xff]  ;;  %s3018_s27 = sshll.u32 %s4439_s26, 3  ;;  %v3682_v52 = vmov 0.0   ;;  %vm3683_vm3 = vmmov 0  }
  0x23   : > { %3240 = vmatprep.subr.mxu0 %v736_v0  ;;  %v733_v5 = vld [vmem:[%s4419_s5 + $0x60] sm:$0xff]  ;;  %s701_s3 = scalar_lea.vmem %s4420_s25, %s4439_s26  ;;  %v732_v6 = vld [vmem:[%s4419_s5 + $0x58] sm:$0xff]  ;;  %v1167_v7 = vshrl.u32 %v707_v4, 7  ;;  %v731_v14 = vld [vmem:[%s4419_s5 + $0x50] sm:$0xff]  ;;  %v708_v30 = vand.u32 127, %v707_v4  ;;  %3275 = vmatprep.subr.bf16.mxu1 %v3682_v52  ;;  %s4425_s26 = sld [smem:[#allocation18_spill]] }
  0x24   : > { %3241 = vmatpush3.msra.mxu0 %v736_v0  ;;  %s696_s4 = scalar_lea.vmem %s4421_s6, %s3018_s27  ;;  %v861_v8 = vld [vmem:[%s701_s3] sm:$0x1]  ;;  %v862_v9 = vld [vmem:[%s701_s3 + $0x1] sm:$0x1]  ;;  %v730_v16 = vld [vmem:[%s4419_s5 + $0x48] sm:$0xff]  ;;  %3279 = vmatprep.mubr.msk.bf16.mxu1 %vm3683_vm3, %v3682_v52  ;;  %s4424_s3 = sld [smem:[#allocation17_spill]] }
  0x25   : > { %3242 = vmatprep.subr.mxu0 %v735_v1  ;;  %v705_v10 = vld [vmem:[%s696_s4] sm:$0xff]  ;;  %v863_v11 = vsub.f32 1.0, %v861_v8  ;;  %v864_v12 = vsub.f32 1.0, %v862_v9  ;;  %v706_v13 = vld [vmem:[%s696_s4 + $0x8] sm:$0xff]  ;;  %v1168_v15 = vsub.s32 0, %v1167_v7  ;;  %v728_v22 = vld [vmem:[%s4419_s5 + $0x38] sm:$0xff] }
  0x26   : > { %3243 = vmatpush3.msra.mxu0 %v735_v1  ;;  %710 = vperm.xlu0 %3529, %v705_v10   ;;  %v729_v19 = vld [vmem:[%s4419_s5 + $0x40] sm:$0xff]  ;;  %v727_v23 = vld [vmem:[%s4419_s5 + $0x30] sm:$0xff]  ;;  %v726_v24 = vld [vmem:[%s4419_s5 + $0x28] sm:$0xff]  ;;  %vm1069_vm4 = vcmask 130048   ;;  %vm1206_vm5 = vcmask 1043456   ;;  %vm1178_vm6 = vcmask 64512  }
  0x27   : > { %3244 = vmatprep.subr.mxu0 %v734_v3  ;;  %v865_v17 = vmul.f32 -10000.0, %v863_v11  ;;  %v866_v18 = vmul.f32 -10000.0, %v864_v12  ;;  %v725_v25 = vld [vmem:[%s4419_s5 + $0x20] sm:$0xff]  ;;  %v724_v26 = vld [vmem:[%s4419_s5 + $0x18] sm:$0xff]  ;;  %v723_v27 = vld [vmem:[%s4419_s5 + $0x10] sm:$0xff]  ;;  %vm1805_vm7 = vcmask 523264  }
  0x28   : > { %3245 = vmatpush3.msra.mxu0 %v734_v3  ;;  %v722_v28 = vld [vmem:[%s4419_s5 + $0x8] sm:$0xff]  ;;  %v721_v29 = vld [vmem:[%s4419_s5] sm:$0xff]  ;;  %s691_s6 = scalar_lea.vmem [#allocation2], %s3016_s23  ;;  %s4324_s25 = scalar_lea.sflag [#allocation3], %s689_s1 }
  0x29   : > { %3246 = vmatprep.subr.mxu0 %v733_v5  ;;  %v3882_v20 = vrot.slane %v865_v17, %v1168_v15  ;;  %v3884_v21 = vrot.slane %v866_v18, %v1168_v15  ;;  %v812_v35 = vld [vmem:[%s4422_s0] sm:$0xff]  ;;  %v3530_v51 = vld [vmem:[%s4423_s24 + $0x8] sm:$0xff]   ;;  %s4427_s0 = sld [smem:[#allocation8_spill]]  ;;  %s2941_s4 = sshll.u32 %s691_s6, 4  ;;  %s4321_s4 = int_to_ptr.vmem [resolvable:$true] %s2941_s4 }
  0x2a   : > { %3247 = vmatpush3.msra.mxu0 %v733_v5  ;;  %713 = vperm.xlu0 %3529, %v706_v13   ;;  %v3531_v53 = vld [vmem:[%s4423_s24] sm:$0xff]   ;;  %v3534_v9 = vld [vmem:[%s4374_s10 + $0x8] sm:$0xff]   ;;  %s3685_s23 = smov [#allocation2]  }
  0x2b   : > { %3248 = vmatprep.subr.mxu0 %v732_v6  ;;  %3276 = vmatpush3.bf16.msra.mxu1 %v3530_v51  ;;  %v3024_v62 = vld [vmem:[%s4424_s3] ss:$0 sm:$0xff]  ;;  %s3622_s22 = sshll.u32 %s3685_s23, 4  ;;  %s3623_s22 = int_to_ptr.vmem [resolvable:$false] %s3622_s22 }
  0x2c   : > { %3249 = vmatpush3.msra.mxu0 %v732_v6  ;;  %3277 = vmatprep.subr.bf16.mxu1 %v3682_v52  ;;  %v3025_v2 = vld [vmem:[%s4425_s26] ss:$0 sm:$0xff]  ;;  %v3532_v6 = vld [vmem:[%s4372_s8 + $0x8] sm:$0xff]   ;;  %s3684_s26 = smov 112   ;;  %p3625_p0 = scmp.lt.s32.totalorder %s4321_s4, %s3623_s22 }
  0x2d   : > { %3250 = vmatprep.subr.mxu0 %v731_v14  ;;  %v3533_v8 = vld [vmem:[%s4372_s8] sm:$0xff]  }
  0x2e   : > { %3251 = vmatpush3.msra.mxu0 %v731_v14  ;;  %v3535_v10 = vld [vmem:[%s4374_s10] sm:$0xff]  }
  0x2f   : > { %3252 = vmatprep.subr.mxu0 %v730_v16  ;;  %3278 = vmatpush3.bf16.msra.mxu1 %v3531_v53  ;;  %v3030_v15 = vld [vmem:[%s4373_s9] ss:$0 sm:$0xff]  ;;  %s3147_s3 = sshll.u32 %s4427_s0, 8  ;;  %s3618_s0 = scalar_lea.vmem %s4321_s4, 256 }
  0x30   : > { %3253 = vmatpush3.msra.mxu0 %v730_v16  ;;  %3283 = vmatprep.subr.bf16.mxu1 %v3682_v52  ;;  %p3619_p11 = scmp.ne.s32.totalorder %s4321_s4, %s3618_s0 }
  0x31   : > { %3254 = vmatprep.subr.mxu0 %v729_v19 }
  0x32   : > { %3255 = vmatpush3.msra.mxu0 %v729_v19  ;;  %p3620_p12 = pnand %p3619_p11, %p3841_p5 }
  0x33   : > { %3256 = vmatprep.subr.mxu0 %v728_v22 }
  0x34   : > { %3257 = vmatpush3.msra.mxu0 %v728_v22  ;;  %v3026_v22 = vld [vmem:[%s4426_s7] ss:$0 sm:$0xff]  ;;  %p3621_p13 = pneg %p3620_p12 }
  0x35   : > { %3258 = vmatprep.subr.mxu0 %v727_v23 }
  0x36   : > { %3259 = vmatpush3.msra.mxu0 %v727_v23 }
  0x37   : > { %3260 = vmatprep.subr.mxu0 %v726_v24 }
  0x38   : > { %3261 = vmatpush3.msra.mxu0 %v726_v24 }
  0x39   : > { %3262 = vmatprep.subr.mxu0 %v725_v25 }
  0x3a   : > { %3263 = vmatpush3.msra.mxu0 %v725_v25 }
  0x3b   : > { %3264 = vmatprep.subr.mxu0 %v724_v26 }
  0x3c   : > { %3265 = vmatpush3.msra.mxu0 %v724_v26 }
  0x3d   : > { %3266 = vmatprep.subr.mxu0 %v723_v27 }
  0x3e   : > { %3267 = vmatpush3.msra.mxu0 %v723_v27 }
  0x3f   : > { %3268 = vmatprep.subr.mxu0 %v722_v28 }
  0x40   : > { %3269 = vmatpush3.msra.mxu0 %v722_v28 }
  0x41   : > { %3270 = vmatprep.subr.mxu0 %v721_v29 }
  0x42   : > { %3271 = vmatpush3.msra.mxu0 %v721_v29 }
  0x43   : > { %3317 = vmatprep.subr.bf16.mxu0 %v3682_v52 }
  0xa1   : > { %v711_v31 = vpop.permute.xlu0 %710 }
  0xa2   : > { %vm715_vm0 = vcmp.eq.s32.totalorder %v708_v30, %v711_v31 }
  0xa3   : > { %3272 = vmatprep.mubr.msk.f32.mxu0 %vm715_vm0, %v3681_v32 }
  0xa5   : > { %v714_v33 = vpop.permute.xlu0 %713 }
  0xa6   : > { %vm716_vm1 = vcmp.eq.s32.totalorder %v708_v30, %v714_v33  ;;  %v3034_v30 = vld [vmem:[%s4375_s11] ss:$0 sm:$0xff] }
  0xa7   : > { %3273 = vmatmul.mubr.msk.f32.vlgmr.msra.gmra.mxu0 %vm716_vm1, %v3681_v32 }
  0xa8   : > { %3319 = vmatprep.mubr.msk.bf16.mxu0 %vm3683_vm3, %v3682_v52 }
 0x167   : > { %v3274_v34 = vpop.f32.mrf.mxu0 }
 0x168   : > { %v814_v38 = vadd.f32 %v3274_v34, %v812_v35 }
 0x169   : > { %v803_v36 = vpop.f32.mrf.mxu0 }
 0x16a   : > { %v813_v37 = vadd.f32 %v812_v35, %v803_v36  ;;  %v821_v40 = vsel %vm817_vm2, %v814_v38, 0.0 }
 0x16c   : > { %v818_v39 = vsel %vm817_vm2, %v813_v37, 0.0 }
 0x16d   : > { %819 = vadd.xlane.f32.xlu1 %v818_v39 }
 0x171   : > { %822 = vadd.xlane.f32.xlu1 %v821_v40 }
 0x1f6   : > { %v820_v41 = vpop.xlane.xlu1 %819 }
 0x1f7   : > { %v825_v42 = vmul.f32 0.03125, %v820_v41 }
 0x1f9   : > { %v827_v43 = vsub.f32 %v813_v37, %v825_v42 }
 0x1fa   : > { %v823_v44 = vpop.xlane.xlu1 %822 }
 0x1fb   : > { %v826_v45 = vmul.f32 0.03125, %v823_v44  ;;  %v829_v46 = vmul.f32 %v827_v43, %v827_v43 }
 0x1fd   : > { %v828_v47 = vsub.f32 %v814_v38, %v826_v45  ;;  %v831_v48 = vsel %vm817_vm2, %v829_v46, 0.0 }
 0x1fe   : > { %832 = vadd.xlane.f32.xlu0 %v831_v48 }
 0x1ff   : > { %v830_v49 = vmul.f32 %v828_v47, %v828_v47 }
 0x201   : > { %v834_v50 = vsel %vm817_vm2, %v830_v49, 0.0 }
 0x202   : > { %835 = vadd.xlane.f32.xlu1 %v834_v50 }
 0x287   : > { %v833_v54 = vpop.xlane.xlu0 %832 }
 0x288   : > { %v837_v55 = vmul.f32 0.03125, %v833_v54 }
 0x28a   : > { %v839_v56 = vadd.f32 1e-12, %v837_v55 }
 0x28b   : > { %v836_v57 = vpop.xlane.xlu1 %835 }
 0x28c   : > { %3558 = vrsqrt.f32 %v839_v56  ;;  %v838_v58 = vmul.f32 0.03125, %v836_v57 }
 0x28e   : > { %v840_v59 = vadd.f32 1e-12, %v838_v58 }
 0x290   : > { %3560 = vrsqrt.f32 %v840_v59 }
 0x299   : > { %v3559_v60 = vpop.eup %3558 }
 0x29a   : > { %v843_v61 = vmul.f32 %v3559_v60, %v827_v43 }
 0x29c   : > { %v851_v1 = vmul.f32 %v3024_v62, %v843_v61 }
 0x29d   : > { %v3561_v63 = vpop.eup %3560 }
 0x29e   : > { %v844_v0 = vmul.f32 %v3561_v63, %v828_v47  ;;  %v3937_v4 = vadd.f32 %v3025_v2, %v851_v1 }
 0x2a0   : > { %v852_v3 = vmul.f32 %v3024_v62, %v844_v0 }
 0x2a2   : > { %v3939_v5 = vadd.f32 %v3025_v2, %v852_v3 }
 0x2a4   : > { %v867_v7 = vpack.c.bf16 %v3939_v5, %v3937_v4 }
 0x2a6   : > { %3280 = vmatmul.mubr.msk.bf16.vlgmr.msra.gmra.mxu1 %vm817_vm2, %v867_v7 }
 0x2a7   : > { %3284 = vmatpush3.bf16.msra.mxu1 %v3532_v6  ;;  %3287 = vmatprep.mubr.msk.bf16.mxu1 %vm3683_vm3, %v3682_v52 }
 0x2a8   : > { %3285 = vmatprep.subr.bf16.mxu1 %v3682_v52 }
 0x2ab   : > { %3286 = vmatpush3.bf16.msra.mxu1 %v3533_v8 }
 0x2ac   : > { %3291 = vmatprep.subr.bf16.mxu1 %v3682_v52 }
 0x2ae   : > { %3288 = vmatmul.mubr.msk.bf16.vlgmr.msra.gmra.mxu1 %vm817_vm2, %v867_v7 }
 0x2af   : > { %3292 = vmatpush3.bf16.msra.mxu1 %v3534_v9  ;;  %3295 = vmatprep.mubr.msk.bf16.mxu1 %vm3683_vm3, %v3682_v52 }
 0x2b0   : > { %3293 = vmatprep.subr.bf16.mxu1 %v3682_v52 }
 0x2b3   : > { %3294 = vmatpush3.bf16.msra.mxu1 %v3535_v10 }
 0x2b4   : > { %3299 = vmatprep.subr.bf16.mxu1 %v3682_v52 }
 0x2b6   : > { %3296 = vmatmul.mubr.msk.bf16.vlgmr.msra.gmra.mxu1 %vm817_vm2, %v867_v7 }
 0x2b7   : > { %3301 = vmatprep.mubr.msk.bf16.mxu1 %vm3683_vm3, %v3682_v52 }
 0x366   : > { %v928_v11 = vpop.f32.mrf.mxu1 }
 0x367   : > { %v929_v27 = vadd.f32 %v3026_v22, %v928_v11 }
 0x368   : > { %v3281_v12 = vpop.f32.mrf.mxu1 }
 0x369   : > { %v1063_v32 = vpack.c.bf16 %v929_v27, %v929_v27 }
 0x36a   : > { %v931_v13 = vpop.f32.mrf.mxu1 }
 0x36b   : > { %v932_v38 = vadd.f32 %v3026_v22, %v931_v13 }
 0x36c   : > { %v3282_v14 = vpop.f32.mrf.mxu1 }
 0x36d   : > { %v1064_v42 = vpack.c.bf16 %v932_v38, %v932_v38 }
 0x36e   : > { %v992_v16 = vpop.f32.mrf.mxu1 }
 0x36f   : > { %v993_v17 = vadd.f32 %v3030_v15, %v992_v16 }
 0x370   : > { %v3289_v18 = vpop.f32.mrf.mxu1 }
 0x371   : > { %v1065_v19 = vpack.c.bf16 %v993_v17, %v993_v17 }
 0x372   : > { %v995_v23 = vpop.f32.mrf.mxu1 }
 0x373   : > { %v1074_v24 = vsel %vm1069_vm4, %v1065_v19, 0  ;;  %v996_v25 = vadd.f32 %v3030_v15, %v995_v23 }
 0x374   : > { %v3290_v26 = vpop.f32.mrf.mxu1  ;;  %3300 = vmatpush3.bf16.xpose.msra.mxu1 %v1074_v24 }
 0x375   : > { %v1066_v28 = vpack.c.bf16 %v996_v25, %v996_v25  ;;  %3305 = vmatprep.subr.bf16.mxu1 %v3682_v52 }
 0x376   : > { %v1056_v29 = vpop.f32.mrf.mxu1 }
 0x377   : > { %1355 = vrot.lane.b32.xlu0 %v1066_v28, %s3684_s26  ;;  %v1120_v34 = vsel %vm1069_vm4, %v1066_v28, 0  ;;  %v1057_v35 = vadd.f32 %v3034_v30, %v1056_v29 }
 0x378   : > { %v3297_v31 = vpop.f32.mrf.mxu1 }
 0x379   : > { %v3987_v40 = vpack.c.bf16 %v1057_v35, %v1057_v35 }
 0x37a   : > { %v1059_v33 = vpop.f32.mrf.mxu1 }
 0x37b   : > { %v1060_v36 = vadd.f32 %v3034_v30, %v1059_v33  ;;  %3302 = vmatmul.mubr.msk.bf16.vlgmr.msra.gmra.mxu1 %vm1069_vm4, %v1063_v32  ;;  %v1208_v43 = vsel %vm1206_vm5, %v3987_v40, 0 }
 0x37c   : > { %v3298_v37 = vpop.f32.mrf.mxu1  ;;  %3306 = vmatpush3.bf16.xpose.msra.mxu1 %v1120_v34  ;;  %3307 = vmatprep.mubr.msk.bf16.mxu1 %vm3683_vm3, %v3682_v52 }
 0x37d   : > { %v3984_v39 = vpack.c.bf16 %v1060_v36, %v1060_v36  ;;  %3311 = vmatprep.subr.bf16.mxu1 %v3682_v52 }
 0x37f   : > { %v1254_v41 = vsel %vm1206_vm5, %v3984_v39, 0 }
 0x380   : > { %3318 = vmatpush3.bf16.msra.mxu0 %v1254_v41 }
 0x381   : > { %3329 = vmatprep.subr.bf16.mxu0 %v3682_v52 }
 0x383   : > { %3308 = vmatmul.mubr.msk.bf16.vlgmr.msra.gmra.mxu1 %vm1069_vm4, %v1064_v42 }
 0x384   : > { %3312 = vmatpush3.bf16.msra.mxu1 %v1208_v43  ;;  %3313 = vmatprep.mubr.msk.bf16.mxu1 %vm3683_vm3, %v3682_v52 }
 0x385   : > { %3323 = vmatprep.subr.bf16.mxu1 %v3682_v52 }
 0x3e9   : > { %v1356_v16 = vpop.permute.xlu0 %1355 }
 0x43b   : > { %v1110_v44 = vpop.f32.mrf.mxu1 }
 0x43c   : > { %v1162_v45 = vmul.f32 0.25, %v1110_v44 }
 0x43d   : > { %v3303_v46 = vpop.f32.mrf.mxu1 }
 0x43e   : > { %v1176_v47 = vadd.f32 %v3882_v20, %v1162_v45 }
 0x43f   : > { %v1113_v48 = vpop.f32.mrf.mxu1 }
 0x440   : > { %v1179_v49 = vsel %vm1178_vm6, %v1176_v47, -inf }
 0x441   : > { %1180 = vmax.xlane.f32.xlu1 %v1179_v49  ;;  %v3304_v50 = vpop.f32.mrf.mxu1 }
 0x443   : > { %v1156_v51 = vpop.f32.mrf.mxu1 }
 0x444   : > { %v1163_v53 = vmul.f32 0.25, %v1156_v51 }
 0x445   : > { %v3309_v54 = vpop.f32.mrf.mxu1 }
 0x446   : > { %v1177_v55 = vadd.f32 %v3884_v21, %v1163_v53 }
 0x447   : > { %v1159_v56 = vpop.f32.mrf.mxu1 }
 0x448   : > { %v1182_v57 = vsel %vm1178_vm6, %v1177_v55, -inf }
 0x449   : > { %1183 = vmax.xlane.f32.xlu1 %v1182_v57  ;;  %v3310_v58 = vpop.f32.mrf.mxu1 }
 0x45a   : > { %1303 = vrot.lane.b32.xlu1 %v1065_v19, %s3684_s26  ;;  %v1361_v19 = vsel %vm1069_vm4, %v1356_v16, 0 }
 0x4ca   : > { %v1181_v59 = vpop.xlane.xlu1 %1180 }
 0x4cb   : > { %v1185_v60 = vsub.f32 %v1176_v47, %v1181_v59 }
 0x4cd   : > { %v1187_v61 = vmul.f32 1.442695, %v1185_v60 }
 0x4cf   : > { %3562 = vpow2.f32 %v1187_v61 }
 0x4d2   : > { %v1184_v62 = vpop.xlane.xlu1 %1183 }
 0x4d3   : > { %v1186_v63 = vsub.f32 %v1177_v55, %v1184_v62 }
 0x4d5   : > { %v1189_v0 = vmul.f32 1.442695, %v1186_v63 }
 0x4d6   : > { %v1304_v7 = vpop.permute.xlu1 %1303 }
 0x4d7   : > { %3564 = vpow2.f32 %v1189_v0  ;;  %v1309_v13 = vsel %vm1069_vm4, %v1304_v7, 0 }
 0x4dc   : > { %v3563_v1 = vpop.eup %3562 }
 0x4dd   : > { %v1191_v2 = vsel %vm1178_vm6, %v3563_v1, 0.0 }
 0x4de   : > { %1192 = vadd.xlane.f32.xlu1 %v1191_v2 }
 0x4e4   : > { %v3565_v3 = vpop.eup %3564 }
 0x4e5   : > { %v1194_v6 = vsel %vm1178_vm6, %v3565_v3, 0.0 }
 0x4e6   : > { %1195 = vadd.xlane.f32.xlu1 %v1194_v6  ;;  %v3536_v6 = vld [vmem:[%s4376_s12] sm:$0xff]  }
 0x4f7   : > { %1300 = vrot.lane.b32.xlu1 %v1063_v32, %s3684_s26 }
 0x4fb   : > { %1352 = vrot.lane.b32.xlu1 %v1064_v42, %s3684_s26 }
 0x567   : > { %v1193_v8 = vpop.xlane.xlu1 %1192 }
 0x568   : > { %3566 = vrcp.f32 %v1193_v8  ;;  %v3537_v8 = vld [vmem:[%s4376_s12 + $0x8] sm:$0xff]  }
 0x56f   : > { %v1196_v9 = vpop.xlane.xlu1 %1195 }
 0x570   : > { %3568 = vrcp.f32 %v1196_v9 }
 0x573   : > { %v1301_v18 = vpop.permute.xlu1 %1300 }
 0x575   : > { %v3567_v10 = vpop.eup %3566 }
 0x576   : > { %v1199_v11 = vmul.f32 %v3567_v10, %v3563_v1 }
 0x577   : > { %v1353_v22 = vpop.permute.xlu1 %1352 }
 0x578   : > { %v1201_v12 = vpack.c.bf16 %v1199_v11, %v1199_v11 }
 0x57a   : > { %3314 = vmatmul.mubr.msk.bf16.vlgmr.msra.gmra.mxu1 %vm1178_vm6, %v1201_v12 }
 0x57b   : > { %3324 = vmatpush3.bf16.xpose.msra.mxu1 %v1309_v13  ;;  %3325 = vmatprep.mubr.msk.bf16.mxu1 %vm3683_vm3, %v3682_v52 }
 0x57c   : > { %3335 = vmatprep.subr.bf16.mxu1 %v3682_v52 }
 0x57d   : > { %v3569_v14 = vpop.eup %3568 }
 0x57e   : > { %v1200_v15 = vmul.f32 %v3569_v14, %v3565_v3 }
 0x580   : > { %v1202_v17 = vpack.c.bf16 %v1200_v15, %v1200_v15 }
 0x582   : > { %3320 = vmatmul.mubr.msk.bf16.vlgmr.msra.gmra.mxu0 %vm1178_vm6, %v1202_v17  ;;  %3326 = vmatmul.mubr.msk.bf16.vlgmr.msra.gmra.mxu1 %vm1069_vm4, %v1301_v18 }
 0x583   : > { %3330 = vmatpush3.bf16.xpose.msra.mxu0 %v1361_v19  ;;  %3331 = vmatprep.mubr.msk.bf16.mxu0 %vm3683_vm3, %v3682_v52 }
 0x584   : > { %3341 = vmatprep.subr.bf16.mxu0 %v3682_v52  ;;  %3337 = vmatprep.mubr.msk.bf16.mxu1 %vm3683_vm3, %v3682_v52 }
 0x58a   : > { %3332 = vmatmul.mubr.msk.bf16.vlgmr.msra.gmra.mxu0 %vm1069_vm4, %v1353_v22 }
 0x58b   : > { %3343 = vmatprep.mubr.msk.bf16.mxu0 %vm3683_vm3, %v3682_v52 }
 0x63a   : > { %v4023_v23 = vpop.f32.mrf.mxu1 }
 0x63c   : > { %v3315_v24 = vpop.f32.mrf.mxu1 }
 0x63e   : > { %v1247_v25 = vpop.f32.mrf.mxu1 }
 0x63f   : > { %v3050_v25 = vld [vmem:[%s4377_s13] ss:$0 sm:$0xff] }
 0x640   : > { %v3316_v26 = vpop.f32.mrf.mxu1 }
 0x642   : > { %v4025_v27 = vpop.f32.mrf.mxu0  ;;  %v1345_v28 = vpop.f32.mrf.mxu1 }
 0x643   : > { %v1296_v29 = vpack.c.bf16 %v4025_v27, %v4023_v23  ;;  %v1403_v30 = vmul.f32 0.25, %v1345_v28 }
 0x644   : > { %v3321_v31 = vpop.f32.mrf.mxu0  ;;  %v3327_v32 = vpop.f32.mrf.mxu1 }
 0x645   : > { %v1405_v33 = vadd.f32 %v1403_v30, %v3882_v20 }
 0x646   : > { %v1293_v34 = vpop.f32.mrf.mxu0  ;;  %v1348_v35 = vpop.f32.mrf.mxu1 }
 0x647   : > { %v1407_v36 = vsel %vm1178_vm6, %v1405_v33, -inf }
 0x648   : > { %v3322_v37 = vpop.f32.mrf.mxu0  ;;  %1408 = vmax.xlane.f32.xlu1 %v1407_v36  ;;  %v3328_v38 = vpop.f32.mrf.mxu1 }
 0x64a   : > { %v1397_v41 = vpop.f32.mrf.mxu0 }
 0x64b   : > { %v1404_v42 = vmul.f32 0.25, %v1397_v41 }
 0x64c   : > { %v3333_v43 = vpop.f32.mrf.mxu0 }
 0x64d   : > { %v1406_v44 = vadd.f32 %v1404_v42, %v3884_v21 }
 0x64e   : > { %v1400_v45 = vpop.f32.mrf.mxu0 }
 0x64f   : > { %v1410_v46 = vsel %vm1178_vm6, %v1406_v44, -inf }
 0x650   : > { %1411 = vmax.xlane.f32.xlu0 %v1410_v46  ;;  %v3334_v47 = vpop.f32.mrf.mxu0 }
 0x6d1   : > { %v1409_v48 = vpop.xlane.xlu1 %1408 }
 0x6d2   : > { %v1413_v49 = vsub.f32 %v1405_v33, %v1409_v48  ;;  %v3539_v48 = vld [vmem:[%s4380_s16] sm:$0xff]  }
 0x6d4   : > { %v1415_v50 = vmul.f32 1.442695, %v1413_v49 }
 0x6d6   : > { %3570 = vpow2.f32 %v1415_v50 }
 0x6d9   : > { %v1412_v51 = vpop.xlane.xlu0 %1411 }
 0x6da   : > { %v1414_v53 = vsub.f32 %v1406_v44, %v1412_v51 }
 0x6dc   : > { %v1417_v54 = vmul.f32 1.442695, %v1414_v53 }
 0x6de   : > { %3572 = vpow2.f32 %v1417_v54 }
 0x6e3   : > { %v3571_v55 = vpop.eup %3570 }
 0x6e4   : > { %v1419_v56 = vsel %vm1178_vm6, %v3571_v55, 0.0 }
 0x6e5   : > { %1420 = vadd.xlane.f32.xlu1 %v1419_v56 }
 0x6eb   : > { %v3573_v57 = vpop.eup %3572 }
 0x6ec   : > { %v1422_v58 = vsel %vm1178_vm6, %v3573_v57, 0.0 }
 0x6ed   : > { %1423 = vadd.xlane.f32.xlu0 %v1422_v58  ;;  %v3051_v58 = vld [vmem:[%s4378_s14] ss:$0 sm:$0xff] }
 0x6f6   : > { %1432 = vrot.lane.b32.xlu1 %v3987_v40, %s3684_s26 }
 0x703   : > { %1481 = vrot.lane.b32.xlu0 %v3984_v39, %s3684_s26 }
 0x76e   : > { %v1421_v59 = vpop.xlane.xlu1 %1420 }
 0x76f   : > { %3574 = vrcp.f32 %v1421_v59 }
 0x772   : > { %v1433_v60 = vpop.permute.xlu1 %1432 }
 0x773   : > { %v1438_v61 = vsel %vm1206_vm5, %v1433_v60, 0 }
 0x774   : > { %3336 = vmatpush3.bf16.msra.mxu1 %v1438_v61 }
 0x775   : > { %3347 = vmatprep.subr.bf16.mxu1 %v3682_v52 }
 0x776   : > { %v1424_v62 = vpop.xlane.xlu0 %1423 }
 0x777   : > { %3576 = vrcp.f32 %v1424_v62  ;;  %v3052_v62 = vld [vmem:[%s4379_s15] ss:$0 sm:$0xff] }
 0x77a   : > { %v1482_v63 = vpop.permute.xlu0 %1481 }
 0x77b   : > { %v1487_v0 = vsel %vm1206_vm5, %v1482_v63, 0 }
 0x77c   : > { %v3575_v1 = vpop.eup %3574  ;;  %3342 = vmatpush3.bf16.msra.mxu0 %v1487_v0 }
 0x77d   : > { %v1427_v2 = vmul.f32 %v3575_v1, %v3571_v55  ;;  %3353 = vmatprep.subr.bf16.mxu0 %v3682_v52 }
 0x77f   : > { %v1429_v40 = vpack.c.bf16 %v1427_v2, %v1427_v2 }
 0x781   : > { %3338 = vmatmul.mubr.msk.bf16.vlgmr.msra.gmra.mxu1 %vm1178_vm6, %v1429_v40  ;;  %v3540_v40 = vld [vmem:[%s4382_s18 + $0x18] sm:$0xff]  }
 0x782   : > { %3349 = vmatprep.mubr.msk.bf16.mxu1 %vm3683_vm3, %v3682_v52  ;;  %3348 = vmatpush3.bf16.msra.mxu1 %v3537_v8 }
 0x783   : > { %3359 = vmatprep.subr.bf16.mxu1 %v3682_v52 }
 0x784   : > { %v3577_v39 = vpop.eup %3576 }
 0x785   : > { %v1428_v3 = vmul.f32 %v3577_v39, %v3573_v57  ;;  %v3541_v39 = vld [vmem:[%s4382_s18 + $0x10] sm:$0xff]  }
 0x787   : > { %v1430_v7 = vpack.c.bf16 %v1428_v3, %v1428_v3  ;;  %v3542_v3 = vld [vmem:[%s4382_s18 + $0x8] sm:$0xff]  }
 0x789   : > { %3344 = vmatmul.mubr.msk.bf16.vlgmr.msra.gmra.mxu0 %vm1178_vm6, %v1430_v7  ;;  %v3053_v7 = vld [vmem:[%s4381_s17] ss:$0 sm:$0xff] }
 0x78a   : > { %3354 = vmatpush3.bf16.msra.mxu0 %v3536_v6  ;;  %3355 = vmatprep.mubr.msk.bf16.mxu0 %vm3683_vm3, %v3682_v52  ;;  %v3543_v6 = vld [vmem:[%s4382_s18] sm:$0xff]  }
 0x78b   : > { %3367 = vmatprep.subr.bf16.mxu0 %v3682_v52 }
 0x791   : > { %3356 = vmatmul.mubr.msk.bf16.vlgmr.msra.gmra.mxu0 %vm1069_vm4, %v1296_v29 }
 0x792   : > { %3375 = vmatprep.mubr.msk.bf16.mxu0 %vm3683_vm3, %v3682_v52  ;;  %3368 = vmatpush3.bf16.msra.mxu0 %v3540_v40 }
 0x793   : > { %3369 = vmatprep.subr.bf16.mxu0 %v3682_v52 }
 0x796   : > { %3370 = vmatpush3.bf16.msra.mxu0 %v3541_v39 }
 0x797   : > { %3371 = vmatprep.subr.bf16.mxu0 %v3682_v52 }
 0x79a   : > { %3372 = vmatpush3.bf16.msra.mxu0 %v3542_v3  ;;  %v3548_v3 = vld [vmem:[%s4372_s8 + $0x18] sm:$0xff]  }
 0x79b   : > { %3373 = vmatprep.subr.bf16.mxu0 %v3682_v52 }
 0x79e   : > { %3374 = vmatpush3.bf16.msra.mxu0 %v3543_v6 }
 0x79f   : > { %3395 = vmatprep.subr.bf16.mxu0 %v3682_v52 }
 0x841   : > { %v1474_v9 = vpop.f32.mrf.mxu1 }
 0x843   : > { %v3339_v10 = vpop.f32.mrf.mxu1 }
 0x845   : > { %v1477_v11 = vpop.f32.mrf.mxu1 }
 0x847   : > { %v3340_v12 = vpop.f32.mrf.mxu1 }
 0x849   : > { %v1523_v13 = vpop.f32.mrf.mxu0 }
 0x84a   : > { %v1529_v14 = vpack.c.bf16 %v1523_v13, %v1474_v9 }
 0x84b   : > { %v3345_v15 = vpop.f32.mrf.mxu0 }
 0x84c   : > { %3350 = vmatmul.mubr.msk.bf16.vlgmr.msra.gmra.mxu1 %vm1069_vm4, %v1529_v14 }
 0x84d   : > { %v1526_v16 = vpop.f32.mrf.mxu0  ;;  %3363 = vmatprep.mubr.msk.bf16.mxu1 %vm3683_vm3, %v3682_v52 }
 0x84f   : > { %v3346_v17 = vpop.f32.mrf.mxu0 }
 0x851   : > { %v1625_v18 = vpop.f32.mrf.mxu0 }
 0x853   : > { %v3357_v19 = vpop.f32.mrf.mxu0 }
 0x855   : > { %v1628_v22 = vpop.f32.mrf.mxu0 }
 0x857   : > { %v3358_v23 = vpop.f32.mrf.mxu0 }
 0x90c   : > { %v1575_v24 = vpop.f32.mrf.mxu1 }
 0x90d   : > { %v1626_v26 = vadd.f32 %v1625_v18, %v1575_v24 }
 0x90e   : > { %v3351_v27 = vpop.f32.mrf.mxu1 }
 0x90f   : > { %v1639_v28 = vadd.f32 %v3050_v25, %v1626_v26  ;;  %v3057_v27 = vld [vmem:[%s4383_s19] ss:$0 sm:$0xff] }
 0x910   : > { %v1578_v29 = vpop.f32.mrf.mxu1 }
 0x911   : > { %v1629_v30 = vadd.f32 %v1628_v22, %v1578_v29  ;;  %v1641_v31 = vadd.f32 %v1639_v28, %v3937_v4 }
 0x912   : > { %v3352_v32 = vpop.f32.mrf.mxu1 }
 0x913   : > { %v1640_v33 = vadd.f32 %v3050_v25, %v1629_v30  ;;  %v1645_v34 = vsel %vm817_vm2, %v1641_v31, 0.0 }
 0x914   : > { %1646 = vadd.xlane.f32.xlu1 %v1645_v34 }
 0x915   : > { %v1642_v35 = vadd.f32 %v1640_v33, %v3939_v5  ;;  %v3538_v5 = vld [vmem:[%s4380_s16 + $0x8] sm:$0xff]  }
 0x916   : > { %3360 = vmatpush3.bf16.msra.mxu1 %v3538_v5 }
 0x917   : > { %v1648_v36 = vsel %vm817_vm2, %v1642_v35, 0.0  ;;  %3361 = vmatprep.subr.bf16.mxu1 %v3682_v52 }
 0x918   : > { %1649 = vadd.xlane.f32.xlu0 %v1648_v36 }
 0x91a   : > { %3362 = vmatpush3.bf16.msra.mxu1 %v3539_v48  ;;  %v3544_v48 = vld [vmem:[%s4423_s24 + $0x18] sm:$0xff]  }
 0x91b   : > { %3379 = vmatprep.subr.bf16.mxu1 %v3682_v52 }
 0x99d   : > { %v1647_v37 = vpop.xlane.xlu1 %1646 }
 0x99e   : > { %v1651_v38 = vmul.f32 0.03125, %v1647_v37 }
 0x9a0   : > { %v1653_v41 = vsub.f32 %v1641_v31, %v1651_v38 }
 0x9a1   : > { %v1650_v42 = vpop.xlane.xlu0 %1649 }
 0x9a2   : > { %v1652_v43 = vmul.f32 0.03125, %v1650_v42  ;;  %v1655_v44 = vmul.f32 %v1653_v41, %v1653_v41 }
 0x9a4   : > { %v1654_v45 = vsub.f32 %v1642_v35, %v1652_v43  ;;  %v1657_v46 = vsel %vm817_vm2, %v1655_v44, 0.0 }
 0x9a5   : > { %1658 = vadd.xlane.f32.xlu1 %v1657_v46 }
 0x9a6   : > { %v1656_v4 = vmul.f32 %v1654_v45, %v1654_v45 }
 0x9a8   : > { %v1660_v47 = vsel %vm817_vm2, %v1656_v4, 0.0 }
 0x9a9   : > { %1661 = vadd.xlane.f32.xlu0 %v1660_v47 }
 0xa2e   : > { %v1659_v49 = vpop.xlane.xlu1 %1658 }
 0xa2f   : > { %v1663_v50 = vmul.f32 0.03125, %v1659_v49  ;;  %v3545_v49 = vld [vmem:[%s4374_s10 + $0x18] sm:$0xff]  }
 0xa31   : > { %v1665_v51 = vadd.f32 1e-12, %v1663_v50  ;;  %v3546_v50 = vld [vmem:[%s4423_s24 + $0x10] sm:$0xff]  }
 0xa32   : > { %v1662_v53 = vpop.xlane.xlu0 %1661 }
 0xa33   : > { %3578 = vrsqrt.f32 %v1665_v51  ;;  %v1664_v54 = vmul.f32 0.03125, %v1662_v53  ;;  %v3547_v51 = vld [vmem:[%s4374_s10 + $0x10] sm:$0xff]  }
 0xa35   : > { %v1666_v55 = vadd.f32 1e-12, %v1664_v54 }
 0xa37   : > { %3580 = vrsqrt.f32 %v1666_v55 }
 0xa40   : > { %v3579_v56 = vpop.eup %3578 }
 0xa41   : > { %v1669_v57 = vmul.f32 %v3579_v56, %v1653_v41 }
 0xa43   : > { %v1677_v61 = vmul.f32 %v3051_v58, %v1669_v57 }
 0xa44   : > { %v3581_v59 = vpop.eup %3580 }
 0xa45   : > { %v1670_v60 = vmul.f32 %v3581_v59, %v1654_v45  ;;  %v1685_v0 = vadd.f32 %v3052_v62, %v1677_v61  ;;  %v3063_v61 = vld [vmem:[%s4384_s20] ss:$0 sm:$0xff] }
 0xa47   : > { %v1678_v63 = vmul.f32 %v3051_v58, %v1670_v60 }
 0xa49   : > { %v1686_v1 = vadd.f32 %v3052_v62, %v1678_v63 }
 0xa4b   : > { %v1687_v2 = vpack.c.bf16 %v1686_v1, %v1685_v0 }
 0xa4d   : > { %3364 = vmatmul.mubr.msk.bf16.vlgmr.msra.gmra.mxu1 %vm817_vm2, %v1687_v2 }
 0xa4e   : > { %3383 = vmatprep.mubr.msk.bf16.mxu1 %vm3683_vm3, %v3682_v52  ;;  %3380 = vmatpush3.bf16.msra.mxu1 %v3544_v48 }
 0xa4f   : > { %3381 = vmatprep.subr.bf16.mxu1 %v3682_v52 }
 0xa52   : > { %3382 = vmatpush3.bf16.msra.mxu1 %v3546_v50 }
 0xa53   : > { %3387 = vmatprep.subr.bf16.mxu1 %v3682_v52 }
 0xb0d   : > { %v1748_v8 = vpop.f32.mrf.mxu1 }
 0xb0e   : > { %v1749_v9 = vadd.f32 %v3053_v7, %v1748_v8 }
 0xb0f   : > { %v3365_v10 = vpop.f32.mrf.mxu1 }
 0xb10   : > { %v1757_v11 = vmul.f32 0.70710677, %v1749_v9  ;;  %v1755_v19 = vmul.f32 0.5, %v1749_v9 }
 0xb11   : > { %v1751_v12 = vpop.f32.mrf.mxu1 }
 0xb12   : > { %3582 = verf.f32 %v1757_v11  ;;  %v1752_v13 = vadd.f32 %v3053_v7, %v1751_v12  ;;  %v3549_v7 = vld [vmem:[%s4372_s8 + $0x10] sm:$0xff]  }
 0xb13   : > { %v3366_v14 = vpop.f32.mrf.mxu1 }
 0xb14   : > { %v1758_v15 = vmul.f32 0.70710677, %v1752_v13  ;;  %v1756_v22 = vmul.f32 0.5, %v1752_v13 }
 0xb16   : > { %3584 = verf.f32 %v1758_v15 }
 0xb1f   : > { %v3583_v16 = vpop.eup %3582 }
 0xb20   : > { %v1761_v17 = vadd.f32 1.0, %v3583_v16  ;;  %v3079_v16 = vld [vmem:[%s4373_s9 + $0x1] ss:$0 sm:$0xff] }
 0xb22   : > { %v1763_v24 = vmul.f32 %v1761_v17, %v1755_v19  ;;  %v3088_v19 = vld [vmem:[%s4375_s11 + $0x1] ss:$0 sm:$0xff] }
 0xb23   : > { %v3585_v18 = vpop.eup %3584 }
 0xb24   : > { %v1762_v23 = vadd.f32 1.0, %v3585_v18 }
 0xb26   : > { %v1764_v25 = vmul.f32 %v1762_v23, %v1756_v22 }
 0xb28   : > { %v1765_v26 = vpack.c.bf16 %v1764_v25, %v1763_v24  ;;  %v3070_v24 = vld [vmem:[%s4426_s7 + $0x1] ss:$0 sm:$0xff] }
 0xb2a   : > { %3376 = vmatmul.mubr.msk.bf16.vlgmr.msra.gmra.mxu0 %vm1805_vm7, %v1765_v26 }
 0xb2b   : > { %3399 = vmatprep.mubr.msk.bf16.mxu0 %vm3683_vm3, %v3682_v52  ;;  %3396 = vmatpush3.bf16.msra.mxu0 %v3545_v49 }
 0xb2c   : > { %3397 = vmatprep.subr.bf16.mxu0 %v3682_v52 }
 0xb2f   : > { %3398 = vmatpush3.bf16.msra.mxu0 %v3547_v51 }
 0xb30   : > { %3409 = vmatprep.subr.bf16.mxu0 %v3682_v52 }
 0xbea   : > { %v1843_v28 = vpop.f32.mrf.mxu0 }
 0xbeb   : > { %v1844_v29 = vadd.f32 %v3057_v27, %v1843_v28 }
 0xbec   : > { %v3377_v30 = vpop.f32.mrf.mxu0 }
 0xbed   : > { %v1850_v31 = vadd.f32 %v1844_v29, %v1685_v0 }
 0xbee   : > { %v1846_v32 = vpop.f32.mrf.mxu0 }
 0xbef   : > { %v1847_v33 = vadd.f32 %v3057_v27, %v1846_v32  ;;  %v1854_v34 = vsel %vm817_vm2, %v1850_v31, 0.0 }
 0xbf0   : > { %1855 = vadd.xlane.f32.xlu1 %v1854_v34  ;;  %v3378_v35 = vpop.f32.mrf.mxu0 }
 0xbf1   : > { %v1851_v36 = vadd.f32 %v1847_v33, %v1686_v1  ;;  %v3064_v1 = vld [vmem:[%s4385_s21] ss:$0 sm:$0xff] }
 0xbf3   : > { %v1857_v37 = vsel %vm817_vm2, %v1851_v36, 0.0 }
 0xbf4   : > { %1858 = vadd.xlane.f32.xlu0 %v1857_v37 }
 0xc79   : > { %v1856_v38 = vpop.xlane.xlu1 %1855 }
 0xc7a   : > { %v1860_v41 = vmul.f32 0.03125, %v1856_v38 }
 0xc7c   : > { %v1862_v42 = vsub.f32 %v1850_v31, %v1860_v41 }
 0xc7d   : > { %v1859_v43 = vpop.xlane.xlu0 %1858 }
 0xc7e   : > { %v1861_v44 = vmul.f32 0.03125, %v1859_v43  ;;  %v1864_v45 = vmul.f32 %v1862_v42, %v1862_v42 }
 0xc80   : > { %v1863_v46 = vsub.f32 %v1851_v36, %v1861_v44  ;;  %v1866_v4 = vsel %vm817_vm2, %v1864_v45, 0.0 }
 0xc81   : > { %1867 = vadd.xlane.f32.xlu1 %v1866_v4 }
 0xc82   : > { %v1865_v47 = vmul.f32 %v1863_v46, %v1863_v46 }
 0xc84   : > { %v1869_v5 = vsel %vm817_vm2, %v1865_v47, 0.0 }
 0xc85   : > { %1870 = vadd.xlane.f32.xlu0 %v1869_v5 }
 0xd0a   : > { %v1868_v53 = vpop.xlane.xlu1 %1867 }
 0xd0b   : > { %v1872_v54 = vmul.f32 0.03125, %v1868_v53 }
 0xd0d   : > { %v1874_v55 = vadd.f32 1e-12, %v1872_v54 }
 0xd0e   : > { %v1871_v56 = vpop.xlane.xlu0 %1870 }
 0xd0f   : > { %3586 = vrsqrt.f32 %v1874_v55  ;;  %v1873_v57 = vmul.f32 0.03125, %v1871_v56 }
 0xd11   : > { %v1875_v58 = vadd.f32 1e-12, %v1873_v57 }
 0xd13   : > { %3588 = vrsqrt.f32 %v1875_v58 }
 0xd1c   : > { %v3587_v59 = vpop.eup %3586 }
 0xd1d   : > { %v1878_v60 = vmul.f32 %v3587_v59, %v1862_v42 }
 0xd1f   : > { %v1886_v0 = vmul.f32 %v3063_v61, %v1878_v60 }
 0xd20   : > { %v3589_v62 = vpop.eup %3588 }
 0xd21   : > { %v1879_v63 = vmul.f32 %v3589_v62, %v1863_v46  ;;  %v4140_v40 = vadd.f32 %v3064_v1, %v1886_v0 }
 0xd23   : > { %v1887_v2 = vmul.f32 %v3063_v61, %v1879_v63 }
 0xd25   : > { %v4142_v39 = vadd.f32 %v3064_v1, %v1887_v2 }
 0xd27   : > { %v1896_v6 = vpack.c.bf16 %v4142_v39, %v4140_v40 }
 0xd29   : > { %3384 = vmatmul.mubr.msk.bf16.vlgmr.msra.gmra.mxu1 %vm817_vm2, %v1896_v6  ;;  %3400 = vmatmul.mubr.msk.bf16.vlgmr.msra.gmra.mxu0 %vm817_vm2, %v1896_v6 }
 0xd2a   : > { %3388 = vmatpush3.bf16.msra.mxu1 %v3548_v3  ;;  %3391 = vmatprep.mubr.msk.bf16.mxu1 %vm3683_vm3, %v3682_v52 }
 0xd2b   : > { %3389 = vmatprep.subr.bf16.mxu1 %v3682_v52  ;;  %3411 = vmatprep.mubr.msk.bf16.mxu0 %vm3683_vm3, %v3682_v52 }
 0xd2e   : > { %3390 = vmatpush3.bf16.msra.mxu1 %v3549_v7 }
 0xd2f   : > { %3403 = vmatprep.subr.bf16.mxu1 %v3682_v52 }
 0xd31   : > { %3392 = vmatmul.mubr.msk.bf16.vlgmr.msra.gmra.mxu1 %vm817_vm2, %v1896_v6 }
 0xd32   : > { %3405 = vmatprep.mubr.msk.bf16.mxu1 %vm3683_vm3, %v3682_v52 }
 0xde9   : > { %v1959_v8 = vpop.f32.mrf.mxu1  ;;  %v2091_v9 = vpop.f32.mrf.mxu0 }
 0xdea   : > { %v2092_v26 = vadd.f32 %v3088_v19, %v2091_v9  ;;  %v1960_v30 = vadd.f32 %v3070_v24, %v1959_v8 }
 0xdeb   : > { %v3385_v10 = vpop.f32.mrf.mxu1  ;;  %v3401_v11 = vpop.f32.mrf.mxu0 }
 0xdec   : > { %v4174_v32 = vpack.c.bf16 %v2092_v26, %v2092_v26  ;;  %v2098_v35 = vpack.c.bf16 %v1960_v30, %v1960_v30 }
 0xded   : > { %v1962_v12 = vpop.f32.mrf.mxu1  ;;  %v2094_v13 = vpop.f32.mrf.mxu0 }
 0xdee   : > { %v2095_v33 = vadd.f32 %v3088_v19, %v2094_v13  ;;  %v1963_v36 = vadd.f32 %v3070_v24, %v1962_v12  ;;  %v2228_v37 = vsel %vm1206_vm5, %v4174_v32, 0 }
 0xdef   : > { %v3386_v14 = vpop.f32.mrf.mxu1  ;;  %v3402_v15 = vpop.f32.mrf.mxu0 }
 0xdf0   : > { %v4180_v38 = vpack.c.bf16 %v2095_v33, %v2095_v33  ;;  %v2099_v41 = vpack.c.bf16 %v1963_v36, %v1963_v36 }
 0xdf1   : > { %v2025_v17 = vpop.f32.mrf.mxu1 }
 0xdf2   : > { %v2026_v18 = vadd.f32 %v3079_v16, %v2025_v17  ;;  %v2274_v42 = vsel %vm1206_vm5, %v4180_v38, 0 }
 0xdf3   : > { %v3393_v22 = vpop.f32.mrf.mxu1 }
 0xdf4   : > { %v2100_v23 = vpack.c.bf16 %v2026_v18, %v2026_v18 }
 0xdf5   : > { %v2028_v25 = vpop.f32.mrf.mxu1 }
 0xdf6   : > { %v2108_v27 = vsel %vm1069_vm4, %v2100_v23, 0  ;;  %v2029_v28 = vadd.f32 %v3079_v16, %v2028_v25 }
 0xdf7   : > { %v3394_v29 = vpop.f32.mrf.mxu1  ;;  %3404 = vmatpush3.bf16.xpose.msra.mxu1 %v2108_v27 }
 0xdf8   : > { %v2101_v31 = vpack.c.bf16 %v2029_v28, %v2029_v28  ;;  %3415 = vmatprep.subr.bf16.mxu1 %v3682_v52 }
 0xdfa   : > { %v2154_v34 = vsel %vm1069_vm4, %v2101_v31, 0 }
 0xdfb   : > { %3410 = vmatpush3.bf16.xpose.msra.mxu0 %v2154_v34 }
 0xdfc   : > { %3421 = vmatprep.subr.bf16.mxu0 %v3682_v52 }
 0xdfe   : > { %3406 = vmatmul.mubr.msk.bf16.vlgmr.msra.gmra.mxu1 %vm1069_vm4, %v2098_v35 }
 0xdff   : > { %3416 = vmatpush3.bf16.msra.mxu1 %v2228_v37  ;;  %3417 = vmatprep.mubr.msk.bf16.mxu1 %vm3683_vm3, %v3682_v52 }
 0xe00   : > { %3427 = vmatprep.subr.bf16.mxu1 %v3682_v52 }
 0xe02   : > { %3412 = vmatmul.mubr.msk.bf16.vlgmr.msra.gmra.mxu0 %vm1069_vm4, %v2099_v41 }
 0xe03   : > { %3422 = vmatpush3.bf16.msra.mxu0 %v2274_v42  ;;  %3423 = vmatprep.mubr.msk.bf16.mxu0 %vm3683_vm3, %v3682_v52 }
 0xe04   : > { %3433 = vmatprep.subr.bf16.mxu0 %v3682_v52 }
 0xebe   : > { %v2144_v43 = vpop.f32.mrf.mxu1 }
 0xebf   : > { %v2196_v44 = vmul.f32 0.25, %v2144_v43 }
 0xec0   : > { %v3407_v45 = vpop.f32.mrf.mxu1 }
 0xec1   : > { %v2198_v46 = vadd.f32 %v2196_v44, %v3882_v20 }
 0xec2   : > { %v2147_v4 = vpop.f32.mrf.mxu1  ;;  %v2190_v47 = vpop.f32.mrf.mxu0 }
 0xec3   : > { %v2197_v5 = vmul.f32 0.25, %v2190_v47  ;;  %v2200_v48 = vsel %vm1178_vm6, %v2198_v46, -inf }
 0xec4   : > { %v3413_v49 = vpop.f32.mrf.mxu0  ;;  %2201 = vmax.xlane.f32.xlu1 %v2200_v48  ;;  %v3408_v50 = vpop.f32.mrf.mxu1 }
 0xec5   : > { %v2199_v51 = vadd.f32 %v2197_v5, %v3884_v21 }
 0xec6   : > { %v2193_v53 = vpop.f32.mrf.mxu0 }
 0xec7   : > { %v2203_v54 = vsel %vm1178_vm6, %v2199_v51, -inf }
 0xec8   : > { %2204 = vmax.xlane.f32.xlu0 %v2203_v54  ;;  %v3414_v55 = vpop.f32.mrf.mxu0 }
 0xed5   : > { %2324 = vrot.lane.b32.xlu1 %v2100_v23, %s3684_s26 }
 0xf4d   : > { %v2202_v56 = vpop.xlane.xlu1 %2201 }
 0xf4e   : > { %v2206_v57 = vsub.f32 %v2198_v46, %v2202_v56 }
 0xf50   : > { %v2208_v58 = vmul.f32 1.442695, %v2206_v57 }
 0xf51   : > { %v2205_v59 = vpop.xlane.xlu0 %2204  ;;  %v2325_v2 = vpop.permute.xlu1 %2324 }
 0xf52   : > { %3590 = vpow2.f32 %v2208_v58  ;;  %v2207_v60 = vsub.f32 %v2199_v51, %v2205_v59  ;;  %v2330_v11 = vsel %vm1069_vm4, %v2325_v2, 0 }
 0xf54   : > { %v2210_v61 = vmul.f32 1.442695, %v2207_v60 }
 0xf56   : > { %3592 = vpow2.f32 %v2210_v61 }
 0xf5f   : > { %v3591_v62 = vpop.eup %3590 }
 0xf60   : > { %v2212_v63 = vsel %vm1178_vm6, %v3591_v62, 0.0 }
 0xf61   : > { %2213 = vadd.xlane.f32.xlu1 %v2212_v63 }
 0xf63   : > { %v3593_v0 = vpop.eup %3592 }
 0xf64   : > { %v2215_v1 = vsel %vm1178_vm6, %v3593_v0, 0.0 }
 0xf65   : > { %2216 = vadd.xlane.f32.xlu0 %v2215_v1  ;;  %v3551_v1 = vld [vmem:[%s4376_s12 + $0x18] sm:$0xff]  }
 0xf72   : > { %2321 = vrot.lane.b32.xlu1 %v2098_v35, %s3684_s26 }
 0xf76   : > { %2373 = vrot.lane.b32.xlu1 %v2099_v41, %s3684_s26 }
 0xf7b   : > { %2376 = vrot.lane.b32.xlu0 %v2101_v31, %s3684_s26 }
 0xfea   : > { %v2214_v3 = vpop.xlane.xlu1 %2213 }
 0xfeb   : > { %3594 = vrcp.f32 %v2214_v3 }
 0xfee   : > { %v2217_v6 = vpop.xlane.xlu0 %2216  ;;  %v2322_v16 = vpop.permute.xlu1 %2321 }
 0xfef   : > { %3596 = vrcp.f32 %v2217_v6 }
 0xff2   : > { %v2377_v13 = vpop.permute.xlu0 %2376  ;;  %v2374_v17 = vpop.permute.xlu1 %2373 }
 0xff3   : > { %v2382_v15 = vsel %vm1069_vm4, %v2377_v13, 0 }
 0xff8   : > { %v3595_v7 = vpop.eup %3594 }
 0xff9   : > { %v2220_v8 = vmul.f32 %v3595_v7, %v3591_v62 }
 0xffb   : > { %v2222_v9 = vpack.c.bf16 %v2220_v8, %v2220_v8 }
 0xffc   : > { %v3597_v10 = vpop.eup %3596 }
 0xffd   : > { %3418 = vmatmul.mubr.msk.bf16.vlgmr.msra.gmra.mxu1 %vm1178_vm6, %v2222_v9  ;;  %v2221_v12 = vmul.f32 %v3597_v10, %v3593_v0 }
 0xffe   : > { %3428 = vmatpush3.bf16.xpose.msra.mxu1 %v2330_v11  ;;  %3429 = vmatprep.mubr.msk.bf16.mxu1 %vm3683_vm3, %v3682_v52 }
 0xfff   : > { %v2223_v14 = vpack.c.bf16 %v2221_v12, %v2221_v12  ;;  %3439 = vmatprep.subr.bf16.mxu1 %v3682_v52 }
0x1001   : > { %3424 = vmatmul.mubr.msk.bf16.vlgmr.msra.gmra.mxu0 %vm1178_vm6, %v2223_v14 }
0x1002   : > { %3434 = vmatpush3.bf16.xpose.msra.mxu0 %v2382_v15  ;;  %3435 = vmatprep.mubr.msk.bf16.mxu0 %vm3683_vm3, %v3682_v52 }
0x1003   : > { %3445 = vmatprep.subr.bf16.mxu0 %v3682_v52 }
0x1005   : > { %3430 = vmatmul.mubr.msk.bf16.vlgmr.msra.gmra.mxu1 %vm1069_vm4, %v2322_v16 }
0x1006   : > { %3441 = vmatprep.mubr.msk.bf16.mxu1 %vm3683_vm3, %v3682_v52 }
0x1009   : > { %3436 = vmatmul.mubr.msk.bf16.vlgmr.msra.gmra.mxu0 %vm1069_vm4, %v2374_v17 }
0x100a   : > { %3447 = vmatprep.mubr.msk.bf16.mxu0 %vm3683_vm3, %v3682_v52 }
0x10bd   : > { %v4218_v18 = vpop.f32.mrf.mxu1 }
0x10bf   : > { %v3419_v19 = vpop.f32.mrf.mxu1 }
0x10c1   : > { %v2267_v22 = vpop.f32.mrf.mxu1  ;;  %v4220_v23 = vpop.f32.mrf.mxu0 }
0x10c2   : > { %v2316_v24 = vpack.c.bf16 %v4220_v23, %v4218_v18  ;;  %v3109_v18 = vld [vmem:[%s4377_s13 + $0x1] ss:$0 sm:$0xff] }
0x10c3   : > { %v3420_v25 = vpop.f32.mrf.mxu1  ;;  %v3425_v26 = vpop.f32.mrf.mxu0 }
0x10c5   : > { %v2313_v27 = vpop.f32.mrf.mxu0  ;;  %v2366_v28 = vpop.f32.mrf.mxu1 }
0x10c6   : > { %v2424_v29 = vmul.f32 0.25, %v2366_v28 }
0x10c7   : > { %v3426_v30 = vpop.f32.mrf.mxu0  ;;  %v3431_v31 = vpop.f32.mrf.mxu1 }
0x10c8   : > { %v2426_v33 = vadd.f32 %v2424_v29, %v3882_v20 }
0x10c9   : > { %v2369_v34 = vpop.f32.mrf.mxu1  ;;  %v2418_v35 = vpop.f32.mrf.mxu0 }
0x10ca   : > { %v2425_v36 = vmul.f32 0.25, %v2418_v35  ;;  %v2428_v37 = vsel %vm1178_vm6, %v2426_v33, -inf }
0x10cb   : > { %v3437_v41 = vpop.f32.mrf.mxu0  ;;  %2429 = vmax.xlane.f32.xlu0 %v2428_v37  ;;  %v3432_v42 = vpop.f32.mrf.mxu1 }
0x10cc   : > { %v2427_v43 = vadd.f32 %v2425_v36, %v3884_v21 }
0x10cd   : > { %v2421_v44 = vpop.f32.mrf.mxu0 }
0x10ce   : > { %v2431_v45 = vsel %vm1178_vm6, %v2427_v43, -inf }
0x10cf   : > { %2432 = vmax.xlane.f32.xlu1 %v2431_v45  ;;  %v3438_v46 = vpop.f32.mrf.mxu0  ;;  %v3553_v45 = vld [vmem:[%s4380_s16 + $0x10] sm:$0xff]  }
0x10e0   : > { %2453 = vrot.lane.b32.xlu1 %v4174_v32, %s3684_s26 }
0x1154   : > { %v2430_v4 = vpop.xlane.xlu0 %2429 }
0x1155   : > { %v2434_v20 = vsub.f32 %v2426_v33, %v2430_v4 }
0x1157   : > { %v2436_v47 = vmul.f32 1.442695, %v2434_v20 }
0x1158   : > { %v2433_v5 = vpop.xlane.xlu1 %2432 }
0x1159   : > { %3598 = vpow2.f32 %v2436_v47  ;;  %v2435_v48 = vsub.f32 %v2427_v43, %v2433_v5 }
0x115b   : > { %v2438_v49 = vmul.f32 1.442695, %v2435_v48 }
0x115c   : > { %v2454_v50 = vpop.permute.xlu1 %2453 }
0x115d   : > { %3600 = vpow2.f32 %v2438_v49  ;;  %v2459_v51 = vsel %vm1206_vm5, %v2454_v50, 0 }
0x115e   : > { %3440 = vmatpush3.bf16.msra.mxu1 %v2459_v51  ;;  %v3112_v51 = vld [vmem:[%s4378_s14 + $0x1] ss:$0 sm:$0xff] }
0x115f   : > { %3451 = vmatprep.subr.bf16.mxu1 %v3682_v52 }
0x1166   : > { %v3599_v21 = vpop.eup %3598 }
0x1167   : > { %v2440_v53 = vsel %vm1178_vm6, %v3599_v21, 0.0 }
0x1168   : > { %2441 = vadd.xlane.f32.xlu0 %v2440_v53 }
0x116a   : > { %v3601_v54 = vpop.eup %3600 }
0x116b   : > { %v2443_v32 = vsel %vm1178_vm6, %v3601_v54, 0.0 }
0x116c   : > { %2444 = vadd.xlane.f32.xlu0 %v2443_v32  ;;  %v3113_v32 = vld [vmem:[%s4379_s15 + $0x1] ss:$0 sm:$0xff] }
0x1182   : > { %2502 = vrot.lane.b32.xlu0 %v4180_v38, %s3684_s26  ;;  %v3550_v38 = vld [vmem:[%s4376_s12 + $0x10] sm:$0xff]   ;;  %s4429_s26 = sld [smem:[#allocation21_spill]] }
0x1188   : > { %s4319_s29 = scalar_lea.hbm %s4429_s26, %s3147_s3  ;;  %s3624_s3 = scalar_lea.vmem %s3623_s22, 512 }
0x1189   : > { %p3626_p1 = scmp.lt.s32.totalorder %s3624_s3, %s3618_s0 }
0x118b   : > { %p3627_p2 = por %p3626_p1, %p3625_p0 }
0x118d   : > { %p3628_p3 = pnand %p3627_p2, %p3621_p13 }
0x11f1   : > { %v2442_v55 = vpop.xlane.xlu0 %2441 }
0x11f2   : > { %3602 = vrcp.f32 %v2442_v55 }
0x11f5   : > { %v2445_v56 = vpop.xlane.xlu0 %2444 }
0x11f6   : > { %3604 = vrcp.f32 %v2445_v56 }
0x11f9   : > { %v2503_v57 = vpop.permute.xlu0 %2502 }
0x11fa   : > { %v2508_v58 = vsel %vm1206_vm5, %v2503_v57, 0 }
0x11fb   : > { %3446 = vmatpush3.bf16.msra.mxu0 %v2508_v58 }
0x11fc   : > { %3457 = vmatprep.subr.bf16.mxu0 %v3682_v52 }
0x11ff   : > { %v3603_v59 = vpop.eup %3602 }
0x1200   : > { %v2448_v60 = vmul.f32 %v3603_v59, %v3599_v21  ;;  %v3554_v59 = vld [vmem:[%s4382_s18 + $0x38] sm:$0xff]  }
0x1202   : > { %v2450_v61 = vpack.c.bf16 %v2448_v60, %v2448_v60  ;;  %v3555_v60 = vld [vmem:[%s4382_s18 + $0x30] sm:$0xff]  }
0x1203   : > { %v3605_v62 = vpop.eup %3604 }
0x1204   : > { %3442 = vmatmul.mubr.msk.bf16.vlgmr.msra.gmra.mxu1 %vm1178_vm6, %v2450_v61  ;;  %v2449_v63 = vmul.f32 %v3605_v62, %v3601_v54  ;;  %v3556_v61 = vld [vmem:[%s4382_s18 + $0x28] sm:$0xff]   ;;  %v3557_v62 = vld [vmem:[%s4382_s18 + $0x20] sm:$0xff]  }
0x1205   : > { %3453 = vmatprep.mubr.msk.bf16.mxu1 %vm3683_vm3, %v3682_v52  ;;  %3452 = vmatpush3.bf16.msra.mxu1 %v3551_v1 }
0x1206   : > { %v2451_v0 = vpack.c.bf16 %v2449_v63, %v2449_v63  ;;  %3463 = vmatprep.subr.bf16.mxu1 %v3682_v52  ;;  %v3119_v63 = vld [vmem:[%s4381_s17 + $0x1] ss:$0 sm:$0xff] }
0x1208   : > { %3448 = vmatmul.mubr.msk.bf16.vlgmr.msra.gmra.mxu0 %vm1178_vm6, %v2451_v0 }
0x1209   : > { %3458 = vmatpush3.bf16.msra.mxu0 %v3550_v38  ;;  %3459 = vmatprep.mubr.msk.bf16.mxu0 %vm3683_vm3, %v3682_v52 }
0x120a   : > { %3471 = vmatprep.subr.bf16.mxu0 %v3682_v52 }
0x1210   : > { %3460 = vmatmul.mubr.msk.bf16.vlgmr.msra.gmra.mxu0 %vm1069_vm4, %v2316_v24 }
0x1211   : > { %3479 = vmatprep.mubr.msk.bf16.mxu0 %vm3683_vm3, %v3682_v52  ;;  %3472 = vmatpush3.bf16.msra.mxu0 %v3554_v59 }
0x1212   : > { %3473 = vmatprep.subr.bf16.mxu0 %v3682_v52 }
0x1215   : > { %3474 = vmatpush3.bf16.msra.mxu0 %v3555_v60 }
0x1216   : > { %3475 = vmatprep.subr.bf16.mxu0 %v3682_v52 }
0x1219   : > { %3476 = vmatpush3.bf16.msra.mxu0 %v3556_v61 }
0x121a   : > { %3477 = vmatprep.subr.bf16.mxu0 %v3682_v52 }
0x121d   : > { %3478 = vmatpush3.bf16.msra.mxu0 %v3557_v62 }
0x12c4   : > { %v2495_v2 = vpop.f32.mrf.mxu1 }
0x12c6   : > { %v3443_v3 = vpop.f32.mrf.mxu1 }
0x12c8   : > { %v2498_v6 = vpop.f32.mrf.mxu1  ;;  %v2544_v7 = vpop.f32.mrf.mxu0 }
0x12c9   : > { %v2550_v8 = vpack.c.bf16 %v2544_v7, %v2495_v2 }
0x12ca   : > { %v3444_v9 = vpop.f32.mrf.mxu1  ;;  %v3449_v10 = vpop.f32.mrf.mxu0 }
0x12cb   : > { %3454 = vmatmul.mubr.msk.bf16.vlgmr.msra.gmra.mxu1 %vm1069_vm4, %v2550_v8 }
0x12cc   : > { %v2547_v11 = vpop.f32.mrf.mxu0  ;;  %3467 = vmatprep.mubr.msk.bf16.mxu1 %vm3683_vm3, %v3682_v52 }
0x12ce   : > { %v3450_v12 = vpop.f32.mrf.mxu0 }
0x12d0   : > { %v2646_v13 = vpop.f32.mrf.mxu0 }
0x12d2   : > { %v3461_v14 = vpop.f32.mrf.mxu0 }
0x12d4   : > { %v2649_v15 = vpop.f32.mrf.mxu0 }
0x12d6   : > { %v3462_v16 = vpop.f32.mrf.mxu0 }
0x138b   : > { %v2596_v17 = vpop.f32.mrf.mxu1 }
0x138c   : > { %v2647_v19 = vadd.f32 %v2646_v13, %v2596_v17  ;;  %v3132_v17 = vld [vmem:[%s4383_s19 + $0x1] ss:$0 sm:$0xff] }
0x138d   : > { %v3455_v22 = vpop.f32.mrf.mxu1 }
0x138e   : > { %v2661_v23 = vadd.f32 %v3109_v18, %v2647_v19 }
0x138f   : > { %v2599_v24 = vpop.f32.mrf.mxu1 }
0x1390   : > { %v2650_v25 = vadd.f32 %v2649_v15, %v2599_v24  ;;  %v2663_v26 = vadd.f32 %v2661_v23, %v4140_v40 }
0x1391   : > { %v3456_v27 = vpop.f32.mrf.mxu1 }
0x1392   : > { %v2662_v28 = vadd.f32 %v3109_v18, %v2650_v25  ;;  %v2669_v29 = vsel %vm817_vm2, %v2663_v26, 0.0 }
0x1393   : > { %2670 = vadd.xlane.f32.xlu1 %v2669_v29 }
0x1394   : > { %v2664_v30 = vadd.f32 %v2662_v28, %v4142_v39  ;;  %v3552_v39 = vld [vmem:[%s4380_s16 + $0x18] sm:$0xff]  }
0x1395   : > { %3464 = vmatpush3.bf16.msra.mxu1 %v3552_v39 }
0x1396   : > { %v2672_v31 = vsel %vm817_vm2, %v2664_v30, 0.0  ;;  %3465 = vmatprep.subr.bf16.mxu1 %v3682_v52 }
0x1397   : > { %2673 = vadd.xlane.f32.xlu0 %v2672_v31 }
0x1399   : > { %3466 = vmatpush3.bf16.msra.mxu1 %v3553_v45 }
0x141c   : > { %v2671_v33 = vpop.xlane.xlu1 %2670 }
0x141d   : > { %v2675_v34 = vmul.f32 0.03125, %v2671_v33 }
0x141f   : > { %v2677_v35 = vsub.f32 %v2663_v26, %v2675_v34 }
0x1420   : > { %v2674_v36 = vpop.xlane.xlu0 %2673 }
0x1421   : > { %v2676_v37 = vmul.f32 0.03125, %v2674_v36  ;;  %v2679_v41 = vmul.f32 %v2677_v35, %v2677_v35 }
0x1423   : > { %v2678_v42 = vsub.f32 %v2664_v30, %v2676_v37  ;;  %v2681_v43 = vsel %vm817_vm2, %v2679_v41, 0.0 }
0x1424   : > { %2682 = vadd.xlane.f32.xlu1 %v2681_v43 }
0x1425   : > { %v2680_v40 = vmul.f32 %v2678_v42, %v2678_v42 }
0x1427   : > { %v2684_v44 = vsel %vm817_vm2, %v2680_v40, 0.0 }
0x1428   : > { %2685 = vadd.xlane.f32.xlu0 %v2684_v44 }
0x14ad   : > { %v2683_v46 = vpop.xlane.xlu1 %2682 }
0x14ae   : > { %v2687_v4 = vmul.f32 0.03125, %v2683_v46 }
0x14b0   : > { %v2689_v20 = vadd.f32 1e-12, %v2687_v4 }
0x14b1   : > { %v2686_v47 = vpop.xlane.xlu0 %2685 }
0x14b2   : > { %3606 = vrsqrt.f32 %v2689_v20  ;;  %v2688_v5 = vmul.f32 0.03125, %v2686_v47  ;;  %v3140_v47 = vld [vmem:[%s4384_s20 + $0x1] ss:$0 sm:$0xff] }
0x14b4   : > { %v2690_v48 = vadd.f32 1e-12, %v2688_v5 }
0x14b6   : > { %3608 = vrsqrt.f32 %v2690_v48  ;;  %v3141_v48 = vld [vmem:[%s4385_s21 + $0x1] ss:$0 sm:$0xff] }
0x14bf   : > { %v3607_v49 = vpop.eup %3606 }
0x14c0   : > { %v2693_v50 = vmul.f32 %v3607_v49, %v2677_v35 }
0x14c2   : > { %v2701_v54 = vmul.f32 %v3112_v51, %v2693_v50 }
0x14c3   : > { %v3609_v21 = vpop.eup %3608 }
0x14c4   : > { %v2694_v53 = vmul.f32 %v3609_v21, %v2678_v42  ;;  %v2709_v56 = vadd.f32 %v3113_v32, %v2701_v54 }
0x14c6   : > { %v2702_v55 = vmul.f32 %v3112_v51, %v2694_v53 }
0x14c8   : > { %v2710_v57 = vadd.f32 %v3113_v32, %v2702_v55 }
0x14ca   : > { %v2711_v58 = vpack.c.bf16 %v2710_v57, %v2709_v56 }
0x14cc   : > { %3468 = vmatmul.mubr.msk.bf16.vlgmr.msra.gmra.mxu1 %vm817_vm2, %v2711_v58 }
0x158c   : > { %v2774_v38 = vpop.f32.mrf.mxu1 }
0x158d   : > { %v2775_v0 = vadd.f32 %v3119_v63, %v2774_v38 }
0x158e   : > { %v3469_v1 = vpop.f32.mrf.mxu1 }
0x158f   : > { %v2783_v2 = vmul.f32 0.70710677, %v2775_v0  ;;  %v2781_v11 = vmul.f32 0.5, %v2775_v0 }
0x1590   : > { %v2777_v3 = vpop.f32.mrf.mxu1 }
0x1591   : > { %3610 = verf.f32 %v2783_v2  ;;  %v2778_v6 = vadd.f32 %v3119_v63, %v2777_v3 }
0x1592   : > { %v3470_v7 = vpop.f32.mrf.mxu1 }
0x1593   : > { %v2784_v8 = vmul.f32 0.70710677, %v2778_v6  ;;  %v2782_v12 = vmul.f32 0.5, %v2778_v6 }
0x1595   : > { %3612 = verf.f32 %v2784_v8 }
0x159e   : > { %v3611_v52 = vpop.eup %3610 }
0x159f   : > { %v2787_v9 = vadd.f32 1.0, %v3611_v52 }
0x15a1   : > { %v2789_v14 = vmul.f32 %v2787_v9, %v2781_v11 }
0x15a2   : > { %v3613_v10 = vpop.eup %3612 }
0x15a3   : > { %v2788_v13 = vadd.f32 1.0, %v3613_v10 }
0x15a5   : > { %v2790_v15 = vmul.f32 %v2788_v13, %v2782_v12 }
0x15a7   : > { %v2791_v16 = vpack.c.bf16 %v2790_v15, %v2789_v14 }
0x15a9   : > { %3480 = vmatmul.mubr.msk.bf16.vlgmr.msra.gmra.mxu0 %vm1805_vm7, %v2791_v16 }
0x1669   : > { %v2870_v18 = vpop.f32.mrf.mxu0 }
0x166a   : > { %v2871_v19 = vadd.f32 %v3132_v17, %v2870_v18 }
0x166b   : > { %v3481_v22 = vpop.f32.mrf.mxu0 }
0x166c   : > { %v2877_v23 = vadd.f32 %v2871_v19, %v2709_v56 }
0x166d   : > { %v2873_v24 = vpop.f32.mrf.mxu0 }
0x166e   : > { %v2874_v25 = vadd.f32 %v3132_v17, %v2873_v24  ;;  %v2883_v26 = vsel %vm817_vm2, %v2877_v23, 0.0 }
0x166f   : > { %2884 = vadd.xlane.f32.xlu1 %v2883_v26  ;;  %v3482_v27 = vpop.f32.mrf.mxu0 }
0x1670   : > { %v2878_v28 = vadd.f32 %v2874_v25, %v2710_v57 }
0x1672   : > { %v2886_v29 = vsel %vm817_vm2, %v2878_v28, 0.0 }
0x1673   : > { %2887 = vadd.xlane.f32.xlu0 %v2886_v29 }
0x16f8   : > { %v2885_v30 = vpop.xlane.xlu1 %2884 }
0x16f9   : > { %v2889_v31 = vmul.f32 0.03125, %v2885_v30 }
0x16fb   : > { %v2891_v33 = vsub.f32 %v2877_v23, %v2889_v31 }
0x16fc   : > { %v2888_v34 = vpop.xlane.xlu0 %2887 }
0x16fd   : > { %v2890_v35 = vmul.f32 0.03125, %v2888_v34  ;;  %v2893_v36 = vmul.f32 %v2891_v33, %v2891_v33 }
0x16ff   : > { %v2892_v37 = vsub.f32 %v2878_v28, %v2890_v35  ;;  %v2895_v41 = vsel %vm817_vm2, %v2893_v36, 0.0 }
0x1700   : > { %2896 = vadd.xlane.f32.xlu1 %v2895_v41 }
0x1701   : > { %v2894_v42 = vmul.f32 %v2892_v37, %v2892_v37 }
0x1703   : > { %v2898_v43 = vsel %vm817_vm2, %v2894_v42, 0.0 }
0x1704   : > { %2899 = vadd.xlane.f32.xlu0 %v2898_v43 }
0x1789   : > { %v2897_v40 = vpop.xlane.xlu1 %2896 }
0x178a   : > { %v2901_v44 = vmul.f32 0.03125, %v2897_v40 }
0x178c   : > { %v2903_v39 = vadd.f32 1e-12, %v2901_v44 }
0x178d   : > { %v2900_v45 = vpop.xlane.xlu0 %2899 }
0x178e   : > { %3614 = vrsqrt.f32 %v2903_v39  ;;  %v2902_v46 = vmul.f32 0.03125, %v2900_v45 }
0x1790   : > { %v2904_v4 = vadd.f32 1e-12, %v2902_v46 }
0x1792   : > { %3616 = vrsqrt.f32 %v2904_v4 }
0x179b   : > { %v3615_v20 = vpop.eup %3614 }
0x179c   : > { %v2907_v5 = vmul.f32 %v3615_v20, %v2891_v33 }
0x179e   : > { %v2915_v49 = vmul.f32 %v3140_v47, %v2907_v5 }
0x179f   : > { %v3617_v50 = vpop.eup %3616 }
0x17a0   : > { %v2908_v51 = vmul.f32 %v3617_v50, %v2892_v37  ;;  %v2923_v21 = vadd.f32 %v3141_v48, %v2915_v49 }
0x17a2   : > { %v2916_v53 = vmul.f32 %v3140_v47, %v2908_v51  ;;  %2925 = vst.msk [vmem:[%s691_s6] sm:$0xff] %vm817_vm2, %v2923_v21 }
0x17a4   : > { %v2924_v54 = vadd.f32 %v3141_v48, %v2916_v53 }
0x17a6   : > { %2926 = vst.msk [vmem:[%s691_s6 + $0x8] sm:$0xff] %vm817_vm2, %v2924_v54 }
0x17a7   : > { %3631 = shalt.err (!%p3628_p3)
}
0x17a8   : > { %s3632_s1 = scalar_lea.hbm %s4319_s29, 256  ;;  %s3636_s27 = scalar_lea.hbm %s4429_s26, 512 }
0x17a9   : > { %p3633_p4 = scmp.ne.s32.totalorder %s4319_s29, %s3632_s1  ;;  %p3637_p9 = scmp.lt.s32.totalorder %s4319_s29, %s4429_s26 }
0x17aa   : > { %p3638_p10 = scmp.lt.s32.totalorder %s3636_s27, %s3632_s1 }
0x17ab   : > { %p3634_p7 = pnand %p3633_p4, %p3841_p5 }
0x17ac   : > { %p3639_p11 = por %p3638_p10, %p3637_p9 }
0x17ad   : > { %p3635_p8 = pneg %p3634_p7 }
0x17af   : > { %p3640_p12 = pnand %p3639_p11, %p3635_p8 }
0x17b1   : > { %3643 = shalt.err (!%p3640_p12)
}
0x17b2   : > { %s3686_s0 = smov 128   ;;  %s3687_s22 = smov 8  }
0x17b3   : > { %3483 = dma.vmem_to_hbm [thread:$0]  (%p3841_p5), %s4321_s4, 256, %s4319_s29, %s4324_s25, %s3686_s0, %s3686_s0, %s3687_s22  }
0x17b4 PF: > { %s4430_s3 = sld [smem:[#allocation7_spill]] }
0x17b5   : > { %s4431_s6 = sld [smem:[#allocation5_spill]] }
0x17ba   : > { %p3489_p13 = scmp.ge.s32.totalorder %s4430_s3, 2 }
0x17bb   : > { %s2956_s7 = sand.u32 1, %s4431_s6  }
0x17bc   : > { %p3486_p0 = pnand %p3489_p13, %p3845_p6  ;;  %s2957_s5 = scalar_lea.sflag [#allocation3], %s2956_s7 }
0x17be   : > { %p3487_p1 = pneg %p3486_p0 }
0x17c0   : > { %3661 = dma.done.wait (%p3487_p1), %s2957_s5, 256  }
0x17c1   : > { %3663 = vsyncadd (%p3487_p1), %s2957_s5, 4294967040  ;;  %s4433_s30 = sld [smem:[#allocation9_spill]]  ;;  %s4436_s3 = smov %s3670_s28 }
0x17c2   : > { %s4434_s1 = sld [smem:[#allocation6_spill]] }
0x17c3   : > { %s4435_s29 = sld [smem:[#allocation10_spill]] }
0x17c7   : > { %p32_p2 = scmp.ge.s32.totalorder %s4433_s30, 4  }
0x17c8   : > { %s4437_s28 = smov %s4434_s1 }
0x17c9   :  { %34 = sbr.rel (!%p32_p2) target bundleno = 13 (0xd), region = 162 }
0x17ce   :  { %2962 = vsyncpa [#allocation3], 1 }
0x17cf   :  { %2964 = vsyncpa [#allocation3 + $0x1], 1 }

</bundles_post_ra>
